<compile_context>
chip_gen: v7x
topology: tpu7x:2x2x1
jax: 0.10.0
libtpu: 0.0.40
codegen_flags: <defaults>
</compile_context>

<pallas_src>
import jax
import jax.numpy as jnp
from jax.experimental import pallas as pl
from jax.experimental.pallas import tpu as pltpu

HIDDEN = 256


def softq_kernel(xa_ref, w1_ref, b1_ref, w2_ref, b2_ref, w3_ref, b3_ref, out_ref):
    # fc1: relu(cat([x, a]) @ W1 + b1) -- xa arrives already bf16, MXU consumes it directly.
    h1 = jnp.dot(xa_ref[...], w1_ref[...], preferred_element_type=jnp.float32) + b1_ref[...]
    h1 = jnp.maximum(h1, 0.0)

    # fc2: relu(h1 @ W2 + b2)  (bf16 matmul inputs, f32 accumulate)
    h2 = jnp.dot(h1.astype(jnp.bfloat16), w2_ref[...],
                 preferred_element_type=jnp.float32) + b2_ref[...]
    h2 = jnp.maximum(h2, 0.0)                                   # (TB, 256), f32

    # fc3 (256 -> 1): VPU multiply + lane reduce instead of an N=1 MXU matmul.
    # Group the TB batch rows as (TB//128, 128, 256) -- a free major-dim split --
    # so the result lands as a lane-dense (TB//128, 128) slab (unmasked vst).
    rows, lanes = out_ref.shape                                 # lanes == 128
    w3 = w3_ref[...].astype(jnp.float32)                        # (1, 256)
    prod = h2.reshape(rows, lanes, h2.shape[-1]) * w3           # (rows, 128, 256)
    if prod.shape[-1] == 256:
        # Pre-add the two aligned 128-lane halves with one VALU add so the
        # cross-lane XLU reduce only spans 128 lanes (v5e has 3 XLUs, v6e 2).
        prod = prod[..., :128] + prod[..., 128:]                # (rows, 128, 128)
    q = jnp.sum(prod, axis=-1) + b3_ref[0, 0]                   # (rows, 128)
    out_ref[...] = q.astype(out_ref.dtype)


def _round_up(n, m):
    return ((n + m - 1) // m) * m


def _choose_tile_b(B, max_tile_b):
    """Batch tile: adapt to B, keep MXU M-alignment and the lane-dense output legal."""
    if B <= 1024:
        # Single tile sized to the batch (multiple of 256 for MXU M-alignment).
        # Output slab rows (tile_b//128) equal the full array dim, so the
        # (8,128) BlockSpec rule is satisfied even when rows < 8.
        return max(256, _round_up(B, 256))
    # Multi-tile: aim for >= 2 tiles (v7x megacore), tile a multiple of 1024 so
    # output-slab rows stay a multiple of 8; cap at max_tile_b (2048 fits v5e's
    # 16 MiB scoped-VMEM default with room to spare).
    half = _round_up(-(-B // 2), 1024)
    return max(1024, min(max_tile_b, half))


def softq_forward(x, a, params, *, max_tile_b=2048):
    """x: [B, obs_dim], a: [B, act_dim] -> q: [B, 1] (float32)."""
    w1, b1, w2, b2, w3, b3 = params

    B = x.shape[0]
    K = x.shape[1] + a.shape[1]
    H = w2.shape[0]

    # bf16 concat done once in the wrapper (single fused XLA cast+concat):
    # halves activation HBM traffic and the lane-padded VMEM tile.
    xa = jnp.concatenate([x.astype(jnp.bfloat16), a.astype(jnp.bfloat16)], axis=1)

    tile_b = _choose_tile_b(B, max_tile_b)
    num_tiles = -(-B // tile_b)
    assert tile_b % 256 == 0
    if num_tiles > 1:
        # Keeps the per-tile (tile_b//128, 128) output slab's sublane rows % 8 == 0.
        assert tile_b % 1024 == 0

    b_pad = num_tiles * tile_b
    if b_pad != B:
        # Zero rows are safe through bias/ReLU/reduce; sliced off below.
        xa = jnp.pad(xa, ((0, b_pad - B), (0, 0)))

    rows = tile_b // 128                      # output slab rows per tile; lanes fixed at 128
    resident = lambda i: (0, 0)               # same block every step => stays VMEM-resident

    out = pl.pallas_call(
        softq_kernel,
        out_shape=jax.ShapeDtypeStruct((num_tiles * rows, 128), jnp.float32),
        grid=(num_tiles,),
        in_specs=[
            pl.BlockSpec((tile_b, K), lambda i: (i, 0)),          # xa tile (bf16, pipelined)
            pl.BlockSpec((K, H), resident),                        # W1 (bf16)
            pl.BlockSpec((1, H), resident),                        # b1 (f32)
            pl.BlockSpec((H, H), resident),                        # W2 (bf16)
            pl.BlockSpec((1, H), resident),                        # b2 (f32)
            pl.BlockSpec((1, H), resident),                        # W3 row (bf16)
            pl.BlockSpec(memory_space=pltpu.MemorySpace.SMEM),     # b3 scalar
        ],
        out_specs=pl.BlockSpec((rows, 128), lambda i: (i, 0)),
        compiler_params=pltpu.CompilerParams(
            dimension_semantics=("parallel",),   # v7x: shard batch tiles across both TCs
        ),
    )(xa, w1, b1, w2, b2, w3, b3)

    # (num_tiles*rows, 128) row-major flatten == batch order (tile, row, lane).
    return out.reshape(b_pad, 1)[:B]


def init_params(key, obs_dim, act_dim, hidden=HIDDEN):
    """PyTorch nn.Linear-style init (U(-k, k), k = 1/sqrt(fan_in)).

    Weights stored transposed ([in, out]) in bf16 (halves weight DMA; matmuls
    accumulate in f32). Biases stay f32. fc3's weight is a (1, hidden) row so
    the kernel can do a VPU/XLU reduce instead of an N=1 matmul.
    """
    in_dim = obs_dim + act_dim
    ks = jax.random.split(key, 6)

    def uni(k, shape, fan_in):
        bound = 1.0 / jnp.sqrt(jnp.float32(fan_in))
        return jax.random.uniform(k, shape, jnp.float32, -bound, bound)

    w1 = uni(ks[0], (in_dim, hidden), in_dim).astype(jnp.bfloat16)
    b1 = uni(ks[1], (1, hidden), in_dim)
    w2 = uni(ks[2], (hidden, hidden), hidden).astype(jnp.bfloat16)
    b2 = uni(ks[3], (hidden, hidden), hidden)[:1]  # placeholder row; replaced below
    b2 = uni(ks[3], (1, hidden), hidden)
    w3 = uni(ks[4], (1, hidden), hidden).astype(jnp.bfloat16)   # fc3 weight row
    b3 = uni(ks[5], (1, 1), hidden)                             # fc3 bias (SMEM scalar)
    return (w1, b1, w2, b2, w3, b3)


def _ref_forward(x, a, params):
    """Plain-JAX reference matching the kernel's precision path (bf16 matmul inputs, f32 accum)."""
    w1, b1, w2, b2, w3, b3 = params
    f32 = lambda t: t.astype(jnp.float32)
    xa = f32(jnp.concatenate([x, a], axis=1).astype(jnp.bfloat16))
    h = jnp.maximum(xa @ f32(w1) + b1, 0.0)
    h = jnp.maximum(f32(h.astype(jnp.bfloat16)) @ f32(w2) + b2, 0.0)
    return h @ f32(w3).T + b3


if __name__ == "__main__":
    OBS, ACT = 16, 8

    key = jax.random.PRNGKey(0)
    kx, ka, kp = jax.random.split(key, 3)
    params = init_params(kp, OBS, ACT)

    # B=2: tiny-batch / single adaptive tile path.
    # B=1300: multi-tile path (tile_b=1024, 2 grid steps) + non-divisible-B pad/slice invariant.
    for B in (2, 1300):
        x = jax.random.normal(kx, (B, OBS), jnp.float32)
        a = jax.random.normal(ka, (B, ACT), jnp.float32)

        q = jax.block_until_ready(softq_forward(x, a, params))
        ref = _ref_forward(x, a, params)

        assert q.shape == (B, 1), q.shape
        assert jnp.allclose(q, ref, atol=1e-2, rtol=1e-2), (B, q[:4], ref[:4])

    print("KERNEL_OK")
</pallas_src>

<mosaic_0001>
module attributes {stable_mosaic.version = 11 : i64} {
  func.func @softq_kernel(%arg0: i32, %arg1: memref<256x24xbf16, #tpu.memory_space<vmem>>, %arg2: memref<24x256xbf16, #tpu.memory_space<vmem>>, %arg3: memref<1x256xf32, #tpu.memory_space<vmem>>, %arg4: memref<256x256xbf16, #tpu.memory_space<vmem>>, %arg5: memref<1x256xf32, #tpu.memory_space<vmem>>, %arg6: memref<1x256xbf16, #tpu.memory_space<vmem>>, %arg7: memref<1x1xf32, #tpu.memory_space<smem>>, %arg8: memref<2x128xf32, #tpu.memory_space<vmem>>) attributes {dimension_semantics = [#tpu.dimension_semantics<parallel>], iteration_bounds = array<i64: 1>, scalar_prefetch = 0 : i64, scratch_operands = 0 : i64, tpu.core_type = #tpu.core_type<tc>, window_params = [{transform_indices = @transform_0, window_bounds = array<i64: 256, 24>}, {pipeline_mode = #tpu.pipeline_mode<synchronous>, transform_indices = @transform_1, window_bounds = array<i64: 24, 256>}, {pipeline_mode = #tpu.pipeline_mode<synchronous>, transform_indices = @transform_2, window_bounds = array<i64: 1, 256>}, {pipeline_mode = #tpu.pipeline_mode<synchronous>, transform_indices = @transform_3, window_bounds = array<i64: 256, 256>}, {pipeline_mode = #tpu.pipeline_mode<synchronous>, transform_indices = @transform_4, window_bounds = array<i64: 1, 256>}, {pipeline_mode = #tpu.pipeline_mode<synchronous>, transform_indices = @transform_5, window_bounds = array<i64: 1, 256>}, {transform_indices = @transform_6, window_bounds = array<i64: 1, 1>}, {transform_indices = @transform_7, window_bounds = array<i64: 2, 128>}]} {
    %c0 = arith.constant 0 : index
    %c0_0 = arith.constant 0 : index
    %0 = vector.load %arg1[%c0, %c0_0] : memref<256x24xbf16, #tpu.memory_space<vmem>>, vector<256x24xbf16>
    %c0_1 = arith.constant 0 : index
    %c0_2 = arith.constant 0 : index
    %1 = vector.load %arg2[%c0_1, %c0_2] : memref<24x256xbf16, #tpu.memory_space<vmem>>, vector<24x256xbf16>
    %cst = arith.constant dense<0.000000e+00> : vector<256x256xf32>
    %2 = tpu.matmul %0, %1, %cst {dimension_numbers = #tpu.dot_dimension_numbers<[1], [0], [0], [1], [0, 0, 1, 1], [], []>} : vector<256x24xbf16>, vector<24x256xbf16>, vector<256x256xf32> -> vector<256x256xf32>
    %c0_3 = arith.constant 0 : index
    %c0_4 = arith.constant 0 : index
    %3 = vector.load %arg3[%c0_3, %c0_4] : memref<1x256xf32, #tpu.memory_space<vmem>>, vector<1x256xf32>
    %4 = vector.broadcast %3 : vector<1x256xf32> to vector<256x256xf32>
    %5 = arith.addf %2, %4 : vector<256x256xf32>
    %cst_5 = arith.constant 0.000000e+00 : f32
    %6 = vector.broadcast %cst_5 : f32 to vector<256x256xf32>
    %7 = arith.maximumf %5, %6 : vector<256x256xf32>
    %8 = arith.truncf %7 : vector<256x256xf32> to vector<256x256xbf16>
    %c0_6 = arith.constant 0 : index
    %c0_7 = arith.constant 0 : index
    %9 = vector.load %arg4[%c0_6, %c0_7] : memref<256x256xbf16, #tpu.memory_space<vmem>>, vector<256x256xbf16>
    %cst_8 = arith.constant dense<0.000000e+00> : vector<256x256xf32>
    %10 = tpu.matmul %8, %9, %cst_8 {dimension_numbers = #tpu.dot_dimension_numbers<[1], [0], [0], [1], [0, 0, 1, 1], [], []>} : vector<256x256xbf16>, vector<256x256xbf16>, vector<256x256xf32> -> vector<256x256xf32>
    %c0_9 = arith.constant 0 : index
    %c0_10 = arith.constant 0 : index
    %11 = vector.load %arg5[%c0_9, %c0_10] : memref<1x256xf32, #tpu.memory_space<vmem>>, vector<1x256xf32>
    %12 = vector.broadcast %11 : vector<1x256xf32> to vector<256x256xf32>
    %13 = arith.addf %10, %12 : vector<256x256xf32>
    %cst_11 = arith.constant 0.000000e+00 : f32
    %14 = vector.broadcast %cst_11 : f32 to vector<256x256xf32>
    %15 = arith.maximumf %13, %14 : vector<256x256xf32>
    %c0_12 = arith.constant 0 : index
    %c0_13 = arith.constant 0 : index
    %16 = vector.load %arg6[%c0_12, %c0_13] : memref<1x256xbf16, #tpu.memory_space<vmem>>, vector<1x256xbf16>
    %17 = arith.extf %16 : vector<1x256xbf16> to vector<1x256xf32>
    %18 = vector.shape_cast %15 : vector<256x256xf32> to vector<2x128x256xf32>
    %19 = vector.shape_cast %17 : vector<1x256xf32> to vector<1x1x256xf32>
    %20 = vector.broadcast %19 : vector<1x1x256xf32> to vector<2x128x256xf32>
    %21 = arith.mulf %18, %20 : vector<2x128x256xf32>
    %22 = vector.extract_strided_slice %21 {offsets = [0, 0, 0], sizes = [2, 128, 128], strides = [1, 1, 1]} : vector<2x128x256xf32> to vector<2x128x128xf32>
    %23 = vector.extract_strided_slice %21 {offsets = [0, 0, 128], sizes = [2, 128, 128], strides = [1, 1, 1]} : vector<2x128x256xf32> to vector<2x128x128xf32>
    %24 = arith.addf %22, %23 : vector<2x128x128xf32>
    %cst_14 = arith.constant dense<0.000000e+00> : vector<2x128xf32>
    %25 = vector.multi_reduction <add>, %24, %cst_14 [2] : vector<2x128x128xf32> to vector<2x128xf32>
    %c0_15 = arith.constant 0 : index
    %c0_16 = arith.constant 0 : index
    %26 = memref.load %arg7[%c0_15, %c0_16] : memref<1x1xf32, #tpu.memory_space<smem>>
    %27 = vector.broadcast %26 : f32 to vector<2x128xf32>
    %28 = arith.addf %25, %27 : vector<2x128xf32>
    %c0_17 = arith.constant 0 : index
    %c0_18 = arith.constant 0 : index
    %29 = vector.load %arg8[%c0_17, %c0_18] : memref<2x128xf32, #tpu.memory_space<vmem>>, vector<2x128xf32>
    tpu.vector_store %arg8[%c0_17, %c0_18], %28 {strides = array<i32>} : memref<2x128xf32, #tpu.memory_space<vmem>>, vector<2x128xf32>,
    return
  }
  func.func @transform_0(%arg0: i32) -> (i32, i32) {
    %c0_i32 = arith.constant 0 : i32
    %c0_i32_0 = arith.constant 0 : i32
    return %arg0, %c0_i32 : i32, i32
  }
  func.func @transform_1(%arg0: i32) -> (i32, i32) {
    %c0_i32 = arith.constant 0 : i32
    %c0_i32_0 = arith.constant 0 : i32
    %c0_i32_1 = arith.constant 0 : i32
    return %c0_i32, %c0_i32_0 : i32, i32
  }
  func.func @transform_2(%arg0: i32) -> (i32, i32) {
    %c0_i32 = arith.constant 0 : i32
    %c0_i32_0 = arith.constant 0 : i32
    %c0_i32_1 = arith.constant 0 : i32
    return %c0_i32, %c0_i32_0 : i32, i32
  }
  func.func @transform_3(%arg0: i32) -> (i32, i32) {
    %c0_i32 = arith.constant 0 : i32
    %c0_i32_0 = arith.constant 0 : i32
    %c0_i32_1 = arith.constant 0 : i32
    return %c0_i32, %c0_i32_0 : i32, i32
  }
  func.func @transform_4(%arg0: i32) -> (i32, i32) {
    %c0_i32 = arith.constant 0 : i32
    %c0_i32_0 = arith.constant 0 : i32
    %c0_i32_1 = arith.constant 0 : i32
    return %c0_i32, %c0_i32_0 : i32, i32
  }
  func.func @transform_5(%arg0: i32) -> (i32, i32) {
    %c0_i32 = arith.constant 0 : i32
    %c0_i32_0 = arith.constant 0 : i32
    %c0_i32_1 = arith.constant 0 : i32
    return %c0_i32, %c0_i32_0 : i32, i32
  }
  func.func @transform_6(%arg0: i32) -> (i32, i32) {
    %c0_i32 = arith.constant 0 : i32
    %c0_i32_0 = arith.constant 0 : i32
    %c0_i32_1 = arith.constant 0 : i32
    return %c0_i32, %c0_i32_0 : i32, i32
  }
  func.func @transform_7(%arg0: i32) -> (i32, i32) {
    %c0_i32 = arith.constant 0 : i32
    %c0_i32_0 = arith.constant 0 : i32
    return %arg0, %c0_i32 : i32, i32
  }
}

</mosaic_0001>

<bundles_post_ra>
// kernel: tpu_custom_call.1
= control target key start
LH: loop header
LB: loop body
LE: loop exit
PB: predicated region body
PF: predicated region fallthrough
CT: control target
= control target key end

     0   :  { %13 = vsyncpa [#allocation4], 0  ;;  %s2249_s0 = inlined_call_operand.vmem [shape: bf16[256,24], index: 0, kind: input, shape index: {}]   ;;  %s2250_s1 = inlined_call_operand.vmem [shape: bf16[24,256], index: 1, kind: input, shape index: {}]   ;;  %s2251_s2 = inlined_call_operand.vmem [shape: f32[1,256], index: 2, kind: input, shape index: {}]   ;;  %s2252_s3 = inlined_call_operand.hbm [shape: bf16[256,256], index: 3, kind: input, shape index: {}]   ;;  %s2253_s4 = inlined_call_operand.vmem [shape: f32[1,256], index: 4, kind: input, shape index: {}]   ;;  %s2254_s5 = inlined_call_operand.vmem [shape: bf16[1,256], index: 5, kind: input, shape index: {}]   ;;  %s2255_s6 = inlined_call_operand.<no memory space> [shape: f32[1,1], index: 6, kind: input, shape index: {}]   ;;  %s2256_s7 = inlined_call_operand.hbm [shape: f32[2,128], index: 7, kind: output, shape index: {}]  }
   0x1   :  { %14 = vsyncpa [#allocation5], 0  ;;  %s1670_s24 = smov [#allocation3]   ;;  %s1622_s28 = scalar_lea.hbm %s2252_s3, 4096 }
   0x2   :  { %s26_s25 = sshll.u32 %s1670_s24, 4  ;;  %p1623_p0 = scmp.ne.s32.totalorder %s2252_s3, %s1622_s28  ;;  %s27_s25 = int_to_ptr.vmem [resolvable:$true] %s26_s25 }
   0x3   :  { %p1626_p1 = scmp.lt.u32.totalorder %s1622_s28, %s2252_s3 }
   0x5   :  { %p1628_p2 = pnand %p1626_p1, %p1623_p0 }
   0x7   :  { %1631 = shalt.err (!%p1628_p2)
}
   0x8   :  { %s1632_s10 = scalar_lea.vmem %s27_s25, 4096  ;;  %p1637_p4 = scmp.lt.s32.totalorder %s27_s25, %s27_s25 }
   0x9   :  { %p1633_p3 = scmp.ne.s32.totalorder %s27_s25, %s1632_s10  ;;  %p1638_p5 = scmp.lt.s32.totalorder %s1632_s10, %s1632_s10 }
   0xb   :  { %p1639_p6 = por %p1638_p5, %p1637_p4 }
   0xd   :  { %p1640_p7 = pnand %p1639_p6, %p1633_p3 }
   0xf   :  { %1643 = shalt.err (!%p1640_p7)
}
  0x10   :  { %s1671_s11 = smov 128   ;;  %s1672_s12 = smov 8  }
  0x11   :  { %32 = dma.hbm_to_vmem [thread:$0]  %s2252_s3, 4096, %s27_s25, [#allocation4], %s1671_s11, %s1671_s11, %s1672_s12  }
  0x12   :  { %1666 = dma.done.wait [#allocation4], 4096  }
  0x13   :  { %1667 = vsyncadd [#allocation4], 4294963200  ;;  %v1673_v0 = vmov 0   ;;  %v1553_v1 = vld [vmem:[%s2250_s1 + $0x4] ss:$8 sps:$4 sm:$0xff]   ;;  %v77_v3 = vld [vmem:[%s2250_s1 + $0x10] sm:$0xff]  ;;  %v80_v55 = vlaneseq }
  0x14   :  { %273 = vmatprep.mubr.bf16.mxu0 %v1673_v0  ;;  %v1555_v2 = vld [vmem:[%s2250_s1] ss:$8 sps:$4 sm:$0xff]   ;;  %vm234_vm0 = vcmask 1043456   ;;  %241 = vmatprep.subr.bf16.mxu0 %v1553_v1  ;;  %v1466_v4 = vcombine.high %v77_v3, %v77_v3  ;;  %v1465_v5 = vcombine.low %v77_v3, %v77_v3  ;;  %vm185_vm1 = vcmask 195584   ;;  %v1576_v10 = vld [vmem:[#allocation3 + $0x4] ss:$8 sps:$4 sm:$0xff]  }
  0x15   :  { %242 = vmatpush1.bf16.msra.mxu0 %v1555_v2  ;;  %v1558_v7 = vld [vmem:[%s2249_s0] sm:$0xff]   ;;  %v1559_v8 = vld [vmem:[%s2249_s0 + $0x8] sm:$0xff]   ;;  %v1579_v11 = vld [vmem:[#allocation3 + $0x14] ss:$8 sps:$4 sm:$0xff]   ;;  %1516 = vmatprep.subr.bf16.mxu1 %v1576_v10  ;;  %v1817_v56 = vshrl.u32 %v80_v55, 7  ;;  %vm1249_vm2 = vcmask 130112  }
  0x16   :  { %1467 = vmatprep.subr.msk.bf16.mxu0 %vm234_vm0, %v1466_v4  ;;  %v236_v6 = vsel %vm234_vm0, %v1465_v5, 0  ;;  %v1574_v9 = vld [vmem:[#allocation3] ss:$8 sps:$4 sm:$0xff]   ;;  %v1577_v12 = vld [vmem:[#allocation3 + $0x10] ss:$8 sps:$4 sm:$0xff]   ;;  %vm1256_vm3 = vcmask 195712  }
  0x17   :  { %1532 = vmatpush1.bf16.msra.mxu1 %v1574_v9  ;;  %v1560_v13 = vld [vmem:[%s2249_s0 + $0x10] sm:$0xff]   ;;  %v1582_v14 = vld [vmem:[#allocation3 + $0x24] ss:$8 sps:$4 sm:$0xff]   ;;  %v1580_v15 = vld [vmem:[#allocation3 + $0x20] ss:$8 sps:$4 sm:$0xff]   ;;  %v1820_v57 = vsub.s32 0, %v1817_v56 }
  0x18   :  { %1517 = vmatprep.subr.bf16.mxu1 %v1579_v11  ;;  %v1585_v16 = vld [vmem:[#allocation3 + $0x34] ss:$8 sps:$4 sm:$0xff]   ;;  %v1583_v17 = vld [vmem:[#allocation3 + $0x30] ss:$8 sps:$4 sm:$0xff]   ;;  %v1588_v19 = vld [vmem:[#allocation3 + $0x44] ss:$8 sps:$4 sm:$0xff]  }
  0x19   :  { %244 = vmatpush1.bf16.msra.mxu0 %v236_v6  ;;  %v1561_v18 = vld [vmem:[%s2249_s0 + $0x18] sm:$0xff]   ;;  %v1586_v20 = vld [vmem:[#allocation3 + $0x40] ss:$8 sps:$4 sm:$0xff]   ;;  %v1594_v24 = vld [vmem:[#allocation3 + $0x64] ss:$8 sps:$4 sm:$0xff]   ;;  %v86_v59 = vsub.s32 1, %v1817_v56 }
  0x1a   :  { %734 = vmatprep.subr.bf16.mxu0 %v1576_v10  ;;  %v1591_v21 = vld [vmem:[#allocation3 + $0x54] ss:$8 sps:$4 sm:$0xff]   ;;  %v1589_v22 = vld [vmem:[#allocation3 + $0x50] ss:$8 sps:$4 sm:$0xff]   ;;  %v1562_v23 = vld [vmem:[%s2249_s0 + $0x20] sm:$0xff]   ;;  %vm1263_vm4 = vcmask 261312  }
  0x1b   :  { %1533 = vmatpush1.bf16.msra.mxu1 %v1577_v12  ;;  %v1592_v25 = vld [vmem:[#allocation3 + $0x60] ss:$8 sps:$4 sm:$0xff]   ;;  %v1597_v26 = vld [vmem:[#allocation3 + $0x74] ss:$8 sps:$4 sm:$0xff]   ;;  %v1595_v27 = vld [vmem:[#allocation3 + $0x70] ss:$8 sps:$4 sm:$0xff]  }
  0x1c   :  { %1468 = vmatmul.mubr.msk.bf16.vlgmr.msra.gmra.mrb[0].mxu0 %vm185_vm1, %v1558_v7  ;;  %1518 = vmatprep.subr.bf16.mxu1 %v1582_v14  ;;  %v1563_v28 = vld [vmem:[%s2249_s0 + $0x28] sm:$0xff]   ;;  %v1603_v31 = vld [vmem:[#allocation3 + $0x94] ss:$8 sps:$4 sm:$0xff]   ;;  %v1601_v32 = vld [vmem:[#allocation3 + $0x90] ss:$8 sps:$4 sm:$0xff]   ;;  %vm1270_vm5 = vcmask 326912  }
  0x1d   :  { %283 = vmatprep.mubr.bf16.mxu0 %v1673_v0  ;;  %735 = vmatpush1.bf16.msra.mxu0 %v1574_v9  ;;  %v1600_v29 = vld [vmem:[#allocation3 + $0x84] ss:$8 sps:$4 sm:$0xff]   ;;  %v1598_v30 = vld [vmem:[#allocation3 + $0x80] ss:$8 sps:$4 sm:$0xff]   ;;  %v1564_v33 = vld [vmem:[%s2249_s0 + $0x30] sm:$0xff]   ;;  %vm1277_vm6 = vcmask 392512  }
  0x1e   :  { %736 = vmatprep.subr.bf16.mxu0 %v1579_v11  ;;  %v1606_v34 = vld [vmem:[#allocation3 + $0xa4] ss:$8 sps:$4 sm:$0xff]   ;;  %v1604_v35 = vld [vmem:[#allocation3 + $0xa0] ss:$8 sps:$4 sm:$0xff]   ;;  %v1609_v36 = vld [vmem:[#allocation3 + $0xb4] ss:$8 sps:$4 sm:$0xff]  }
  0x1f   :  { %1534 = vmatpush1.bf16.msra.mxu1 %v1580_v15  ;;  %v1607_v37 = vld [vmem:[#allocation3 + $0xb0] ss:$8 sps:$4 sm:$0xff]   ;;  %v1612_v39 = vld [vmem:[#allocation3 + $0xc4] ss:$8 sps:$4 sm:$0xff]   ;;  %v1610_v40 = vld [vmem:[#allocation3 + $0xc0] ss:$8 sps:$4 sm:$0xff]  }
  0x20   :  { %1519 = vmatprep.subr.bf16.mxu1 %v1585_v16  ;;  %v1565_v38 = vld [vmem:[%s2249_s0 + $0x38] sm:$0xff]   ;;  %v1566_v43 = vld [vmem:[%s2249_s0 + $0x40] sm:$0xff]   ;;  %v1567_v44 = vld [vmem:[%s2249_s0 + $0x48] sm:$0xff]   ;;  %vm1284_vm7 = vcmask 458112   ;;  %vm1291_vm8 = vcmask 523712   ;;  %vm1298_vm9 = vcmask 589312  }
  0x21   :  { %737 = vmatpush1.bf16.msra.mxu0 %v1577_v12  ;;  %v1615_v41 = vld [vmem:[#allocation3 + $0xd4] ss:$8 sps:$4 sm:$0xff]   ;;  %v1613_v42 = vld [vmem:[#allocation3 + $0xd0] ss:$8 sps:$4 sm:$0xff]   ;;  %v1618_v47 = vld [vmem:[#allocation3 + $0xe4] ss:$8 sps:$4 sm:$0xff]  }
  0x22   :  { %738 = vmatprep.subr.bf16.mxu0 %v1582_v14  ;;  %v1568_v45 = vld [vmem:[%s2249_s0 + $0x50] sm:$0xff]   ;;  %v1569_v46 = vld [vmem:[%s2249_s0 + $0x58] sm:$0xff]   ;;  %v1616_v48 = vld [vmem:[#allocation3 + $0xe0] ss:$8 sps:$4 sm:$0xff]   ;;  %vm1305_vm10 = vcmask 654912   ;;  %vm1312_vm11 = vcmask 720512  }
  0x23   :  { %1535 = vmatpush1.bf16.msra.mxu1 %v1583_v17  ;;  %v1621_v49 = vld [vmem:[#allocation3 + $0xf4] ss:$8 sps:$4 sm:$0xff]   ;;  %v1619_v50 = vld [vmem:[#allocation3 + $0xf0] ss:$8 sps:$4 sm:$0xff]   ;;  %v1570_v51 = vld [vmem:[%s2249_s0 + $0x60] sm:$0xff]   ;;  %vm1319_vm12 = vcmask 786112  }
  0x24   :  { %1469 = vmatmul.mubr.msk.bf16.gmra.mrb[4].mxu0 %vm185_vm1, %v1559_v8  ;;  %1520 = vmatprep.subr.bf16.mxu1 %v1588_v19  ;;  %v1571_v52 = vld [vmem:[%s2249_s0 + $0x68] sm:$0xff]   ;;  %v1572_v53 = vld [vmem:[%s2249_s0 + $0x70] sm:$0xff]   ;;  %v1573_v54 = vld [vmem:[%s2249_s0 + $0x78] sm:$0xff]   ;;  %vm1326_vm13 = vcmask 851712   ;;  %vm1333_vm14 = vcmask 917312   ;;  %vm1340_vm15 = vcmask 982912  }
  0x25   :  { %293 = vmatprep.mubr.bf16.mxu0 %v1673_v0  ;;  %739 = vmatpush1.bf16.msra.mxu0 %v1580_v15  ;;  %v78_v58 = vld [vmem:[%s2251_s2] sm:$0x3]  ;;  %vm1347_vm0 = vcmask 1048512  }
  0x26   :  { %740 = vmatprep.subr.bf16.mxu0 %v1585_v16  ;;  %v1827_v60 = vrot.slane %v78_v58, %v1820_v57  ;;  %v1831_v61 = vrot.slane %v78_v58, %v86_v59 }
  0x27   :  { %1536 = vmatpush1.bf16.msra.mxu1 %v1586_v20 }
  0x28   :  { %1521 = vmatprep.subr.bf16.mxu1 %v1591_v21 }
  0x29   :  { %741 = vmatpush1.bf16.msra.mxu0 %v1583_v17 }
  0x2a   :  { %742 = vmatprep.subr.bf16.mxu0 %v1588_v19 }
  0x2b   :  { %1537 = vmatpush1.bf16.msra.mxu1 %v1589_v22 }
  0x2c   :  { %1470 = vmatmul.mubr.msk.bf16.gmra.mrb[8].mxu0 %vm185_vm1, %v1560_v13  ;;  %1522 = vmatprep.subr.bf16.mxu1 %v1594_v24 }
  0x2d   :  { %303 = vmatprep.mubr.bf16.mxu0 %v1673_v0  ;;  %743 = vmatpush1.bf16.msra.mxu0 %v1586_v20 }
  0x2e   :  { %744 = vmatprep.subr.bf16.mxu0 %v1591_v21 }
  0x2f   :  { %1538 = vmatpush1.bf16.msra.mxu1 %v1592_v25 }
  0x30   :  { %1523 = vmatprep.subr.bf16.mxu1 %v1597_v26 }
  0x31   :  { %745 = vmatpush1.bf16.msra.mxu0 %v1589_v22 }
  0x32   :  { %746 = vmatprep.subr.bf16.mxu0 %v1594_v24 }
  0x33   :  { %1539 = vmatpush1.bf16.msra.mxu1 %v1595_v27 }
  0x34   :  { %1471 = vmatmul.mubr.msk.bf16.gmra.mrb[12].mxu0 %vm185_vm1, %v1561_v18  ;;  %1524 = vmatprep.subr.bf16.mxu1 %v1600_v29 }
  0x35   :  { %313 = vmatprep.mubr.bf16.mxu0 %v1673_v0  ;;  %747 = vmatpush1.bf16.msra.mxu0 %v1592_v25 }
  0x36   :  { %748 = vmatprep.subr.bf16.mxu0 %v1597_v26 }
  0x37   :  { %1540 = vmatpush1.bf16.msra.mxu1 %v1598_v30 }
  0x38   :  { %1525 = vmatprep.subr.bf16.mxu1 %v1603_v31 }
  0x39   :  { %749 = vmatpush1.bf16.msra.mxu0 %v1595_v27 }
  0x3a   :  { %750 = vmatprep.subr.bf16.mxu0 %v1600_v29 }
  0x3b   :  { %1541 = vmatpush1.bf16.msra.mxu1 %v1601_v32 }
  0x3c   :  { %1472 = vmatmul.mubr.msk.bf16.gmra.mrb[16].mxu0 %vm185_vm1, %v1562_v23  ;;  %1526 = vmatprep.subr.bf16.mxu1 %v1606_v34 }
  0x3d   :  { %323 = vmatprep.mubr.bf16.mxu0 %v1673_v0  ;;  %751 = vmatpush1.bf16.msra.mxu0 %v1598_v30 }
  0x3e   :  { %752 = vmatprep.subr.bf16.mxu0 %v1603_v31 }
  0x3f   :  { %1542 = vmatpush1.bf16.msra.mxu1 %v1604_v35 }
  0x40   :  { %1527 = vmatprep.subr.bf16.mxu1 %v1609_v36 }
  0x41   :  { %753 = vmatpush1.bf16.msra.mxu0 %v1601_v32 }
  0x42   :  { %754 = vmatprep.subr.bf16.mxu0 %v1606_v34 }
  0x43   :  { %1543 = vmatpush1.bf16.msra.mxu1 %v1607_v37 }
  0x44   :  { %1473 = vmatmul.mubr.msk.bf16.gmra.mrb[20].mxu0 %vm185_vm1, %v1563_v28  ;;  %1528 = vmatprep.subr.bf16.mxu1 %v1612_v39 }
  0x45   :  { %333 = vmatprep.mubr.bf16.mxu0 %v1673_v0  ;;  %755 = vmatpush1.bf16.msra.mxu0 %v1604_v35 }
  0x46   :  { %756 = vmatprep.subr.bf16.mxu0 %v1609_v36 }
  0x47   :  { %1544 = vmatpush1.bf16.msra.mxu1 %v1610_v40 }
  0x48   :  { %1529 = vmatprep.subr.bf16.mxu1 %v1615_v41 }
  0x49   :  { %757 = vmatpush1.bf16.msra.mxu0 %v1607_v37 }
  0x4a   :  { %758 = vmatprep.subr.bf16.mxu0 %v1612_v39 }
  0x4b   :  { %1545 = vmatpush1.bf16.msra.mxu1 %v1613_v42 }
  0x4c   :  { %1474 = vmatmul.mubr.msk.bf16.gmra.mrb[24].mxu0 %vm185_vm1, %v1564_v33  ;;  %1530 = vmatprep.subr.bf16.mxu1 %v1618_v47 }
  0x4d   :  { %343 = vmatprep.mubr.bf16.mxu0 %v1673_v0  ;;  %759 = vmatpush1.bf16.msra.mxu0 %v1610_v40 }
  0x4e   :  { %760 = vmatprep.subr.bf16.mxu0 %v1615_v41 }
  0x4f   :  { %1546 = vmatpush1.bf16.msra.mxu1 %v1616_v48 }
  0x50   :  { %1531 = vmatprep.subr.bf16.mxu1 %v1621_v49 }
  0x51   :  { %761 = vmatpush1.bf16.msra.mxu0 %v1613_v42 }
  0x52   :  { %762 = vmatprep.subr.bf16.mxu0 %v1618_v47 }
  0x53   :  { %1547 = vmatpush1.bf16.msra.mxu1 %v1619_v50 }
  0x54   :  { %1475 = vmatmul.mubr.msk.bf16.gmra.mrb[28].mxu0 %vm185_vm1, %v1565_v38 }
  0x55   :  { %353 = vmatprep.mubr.bf16.mxu0 %v1673_v0  ;;  %763 = vmatpush1.bf16.msra.mxu0 %v1616_v48 }
  0x56   :  { %764 = vmatprep.subr.bf16.mxu0 %v1621_v49 }
  0x59   :  { %765 = vmatpush1.bf16.msra.mxu0 %v1619_v50 }
  0x5c   :  { %1476 = vmatmul.mubr.msk.bf16.gmra.mrb[32].mxu0 %vm185_vm1, %v1566_v43 }
  0x5d   :  { %363 = vmatprep.mubr.bf16.mxu0 %v1673_v0 }
  0x64   :  { %1477 = vmatmul.mubr.msk.bf16.gmra.mrb[36].mxu0 %vm185_vm1, %v1567_v44 }
  0x65   :  { %373 = vmatprep.mubr.bf16.mxu0 %v1673_v0 }
  0x6c   :  { %1478 = vmatmul.mubr.msk.bf16.gmra.mrb[40].mxu0 %vm185_vm1, %v1568_v45 }
  0x6d   :  { %383 = vmatprep.mubr.bf16.mxu0 %v1673_v0 }
  0x74   :  { %1479 = vmatmul.mubr.msk.bf16.gmra.mrb[44].mxu0 %vm185_vm1, %v1569_v46 }
  0x75   :  { %393 = vmatprep.mubr.bf16.mxu0 %v1673_v0 }
  0x7c   :  { %1480 = vmatmul.mubr.msk.bf16.gmra.mrb[48].mxu0 %vm185_vm1, %v1570_v51 }
  0x7d   :  { %403 = vmatprep.mubr.bf16.mxu0 %v1673_v0 }
  0x84   :  { %1481 = vmatmul.mubr.msk.bf16.gmra.mrb[52].mxu0 %vm185_vm1, %v1571_v52 }
  0x85   :  { %413 = vmatprep.mubr.bf16.mxu0 %v1673_v0 }
  0x8c   :  { %1482 = vmatmul.mubr.msk.bf16.gmra.mrb[56].mxu0 %vm185_vm1, %v1572_v53 }
  0x8d   :  { %423 = vmatprep.mubr.bf16.mxu0 %v1673_v0 }
  0x94   :  { %1483 = vmatmul.mubr.msk.bf16.gmra.mrb[60].mxu0 %vm185_vm1, %v1573_v54  ;;  %vm1428_vm1 = vcmask 1041409  }
  0xef   :  { %v275_v62 = vpop.f32.mrb[0].mxu0 }
  0xf0   :  { %v276_v63 = vadd.f32 %v275_v62, %v1827_v60  ;;  %v277_v0 = vpop.f32.mrb[1].mxu0 }
  0xf1   :  { %v278_v1 = vadd.f32 %v277_v0, %v1831_v61  ;;  %v279_v2 = vpop.f32.mrb[2].mxu0 }
  0xf2   :  { %v280_v3 = vadd.f32 %v279_v2, %v1827_v60  ;;  %v281_v4 = vpop.f32.mrb[3].mxu0  ;;  %v434_v6 = vmax.f32 %v276_v63, 0.0 }
  0xf3   :  { %v282_v5 = vadd.f32 %v281_v4, %v1831_v61  ;;  %v435_v8 = vmax.f32 %v278_v1, 0.0 }
  0xf4   :  { %v436_v7 = vmax.f32 %v280_v3, 0.0 }
  0xf5   :  { %v437_v9 = vmax.f32 %v282_v5, 0.0 }
  0xf6   :  { %v498_v10 = vpack.c.bf16 %v436_v7, %v434_v6 }
  0xf7   :  { %v499_v11 = vpack.c.bf16 %v437_v9, %v435_v8  ;;  %v285_v12 = vpop.f32.mrb[4].mxu0 }
  0xf8   :  { %v286_v13 = vadd.f32 %v285_v12, %v1827_v60  ;;  %v287_v14 = vpop.f32.mrb[5].mxu0 }
  0xf9   :  { %v288_v15 = vadd.f32 %v287_v14, %v1831_v61  ;;  %v289_v16 = vpop.f32.mrb[6].mxu0  ;;  %766 = vmatprep.mubr.bf16.mxu0 %v499_v11 }
  0xfa   :  { %v290_v17 = vadd.f32 %v289_v16, %v1827_v60  ;;  %v291_v18 = vpop.f32.mrb[7].mxu0  ;;  %767 = vmatmul.mubr.bf16.vlgmr.msra.gmra.mrb[64].mxu0 %v498_v10  ;;  %v438_v20 = vmax.f32 %v286_v13, 0.0 }
  0xfb   :  { %v292_v19 = vadd.f32 %v291_v18, %v1831_v61  ;;  %v439_v22 = vmax.f32 %v288_v15, 0.0 }
  0xfc   :  { %v440_v21 = vmax.f32 %v290_v17, 0.0 }
  0xfd   :  { %v441_v23 = vmax.f32 %v292_v19, 0.0 }
  0xfe   :  { %v500_v24 = vpack.c.bf16 %v440_v21, %v438_v20 }
  0xff   :  { %v501_v25 = vpack.c.bf16 %v441_v23, %v439_v22  ;;  %v295_v26 = vpop.f32.mrb[8].mxu0 }
 0x100   :  { %v296_v27 = vadd.f32 %v295_v26, %v1827_v60  ;;  %v297_v28 = vpop.f32.mrb[9].mxu0 }
 0x101   :  { %v298_v29 = vadd.f32 %v297_v28, %v1831_v61  ;;  %v299_v30 = vpop.f32.mrb[10].mxu0  ;;  %776 = vmatprep.mubr.bf16.mxu0 %v501_v25 }
 0x102   :  { %v300_v31 = vadd.f32 %v299_v30, %v1827_v60  ;;  %v301_v32 = vpop.f32.mrb[11].mxu0  ;;  %777 = vmatmul.mubr.bf16.gmra.mrb[68].mxu0 %v500_v24  ;;  %v442_v34 = vmax.f32 %v296_v27, 0.0 }
 0x103   :  { %v302_v33 = vadd.f32 %v301_v32, %v1831_v61  ;;  %v443_v36 = vmax.f32 %v298_v29, 0.0 }
 0x104   :  { %v444_v35 = vmax.f32 %v300_v31, 0.0 }
 0x105   :  { %v445_v37 = vmax.f32 %v302_v33, 0.0 }
 0x106   :  { %v502_v38 = vpack.c.bf16 %v444_v35, %v442_v34 }
 0x107   :  { %v503_v39 = vpack.c.bf16 %v445_v37, %v443_v36  ;;  %v305_v40 = vpop.f32.mrb[12].mxu0 }
 0x108   :  { %v306_v41 = vadd.f32 %v305_v40, %v1827_v60  ;;  %v307_v42 = vpop.f32.mrb[13].mxu0 }
 0x109   :  { %v308_v43 = vadd.f32 %v307_v42, %v1831_v61  ;;  %v309_v44 = vpop.f32.mrb[14].mxu0  ;;  %786 = vmatprep.mubr.bf16.mxu0 %v503_v39 }
 0x10a   :  { %v310_v45 = vadd.f32 %v309_v44, %v1827_v60  ;;  %v311_v46 = vpop.f32.mrb[15].mxu0  ;;  %787 = vmatmul.mubr.bf16.gmra.mrb[72].mxu0 %v502_v38  ;;  %v446_v48 = vmax.f32 %v306_v41, 0.0 }
 0x10b   :  { %v312_v47 = vadd.f32 %v311_v46, %v1831_v61  ;;  %v447_v50 = vmax.f32 %v308_v43, 0.0 }
 0x10c   :  { %v448_v49 = vmax.f32 %v310_v45, 0.0 }
 0x10d   :  { %v449_v51 = vmax.f32 %v312_v47, 0.0 }
 0x10e   :  { %v504_v52 = vpack.c.bf16 %v448_v49, %v446_v48 }
 0x10f   :  { %v315_v53 = vpop.f32.mrb[16].mxu0  ;;  %v505_v54 = vpack.c.bf16 %v449_v51, %v447_v50 }
 0x110   :  { %v316_v58 = vadd.f32 %v315_v53, %v1827_v60  ;;  %v317_v62 = vpop.f32.mrb[17].mxu0 }
 0x111   :  { %v318_v63 = vadd.f32 %v317_v62, %v1831_v61  ;;  %v319_v0 = vpop.f32.mrb[18].mxu0  ;;  %796 = vmatprep.mubr.bf16.mxu1 %v505_v54 }
 0x112   :  { %v320_v1 = vadd.f32 %v319_v0, %v1827_v60  ;;  %v321_v2 = vpop.f32.mrb[19].mxu0  ;;  %797 = vmatmul.mubr.bf16.vlgmr.msra.gmra.mrb[0].mxu1 %v504_v52  ;;  %v450_v4 = vmax.f32 %v316_v58, 0.0 }
 0x113   :  { %v322_v3 = vadd.f32 %v321_v2, %v1831_v61  ;;  %v451_v6 = vmax.f32 %v318_v63, 0.0 }
 0x114   :  { %v452_v5 = vmax.f32 %v320_v1, 0.0 }
 0x115   :  { %v453_v7 = vmax.f32 %v322_v3, 0.0 }
 0x116   :  { %v506_v8 = vpack.c.bf16 %v452_v5, %v450_v4 }
 0x117   :  { %v507_v9 = vpack.c.bf16 %v453_v7, %v451_v6  ;;  %v325_v10 = vpop.f32.mrb[20].mxu0 }
 0x118   :  { %v326_v11 = vadd.f32 %v325_v10, %v1827_v60  ;;  %v327_v12 = vpop.f32.mrb[21].mxu0 }
 0x119   :  { %v328_v13 = vadd.f32 %v327_v12, %v1831_v61  ;;  %v329_v14 = vpop.f32.mrb[22].mxu0  ;;  %806 = vmatprep.mubr.bf16.mxu1 %v507_v9 }
 0x11a   :  { %v330_v15 = vadd.f32 %v329_v14, %v1827_v60  ;;  %v331_v16 = vpop.f32.mrb[23].mxu0  ;;  %807 = vmatmul.mubr.bf16.gmra.mrb[4].mxu1 %v506_v8  ;;  %v454_v18 = vmax.f32 %v326_v11, 0.0 }
 0x11b   :  { %v332_v17 = vadd.f32 %v331_v16, %v1831_v61  ;;  %v455_v20 = vmax.f32 %v328_v13, 0.0 }
 0x11c   :  { %v456_v19 = vmax.f32 %v330_v15, 0.0 }
 0x11d   :  { %v457_v21 = vmax.f32 %v332_v17, 0.0 }
 0x11e   :  { %v508_v22 = vpack.c.bf16 %v456_v19, %v454_v18 }
 0x11f   :  { %v509_v23 = vpack.c.bf16 %v457_v21, %v455_v20  ;;  %v335_v24 = vpop.f32.mrb[24].mxu0 }
 0x120   :  { %v336_v25 = vadd.f32 %v335_v24, %v1827_v60  ;;  %v337_v26 = vpop.f32.mrb[25].mxu0 }
 0x121   :  { %v338_v27 = vadd.f32 %v337_v26, %v1831_v61  ;;  %v339_v28 = vpop.f32.mrb[26].mxu0  ;;  %816 = vmatprep.mubr.bf16.mxu1 %v509_v23 }
 0x122   :  { %v340_v29 = vadd.f32 %v339_v28, %v1827_v60  ;;  %v341_v30 = vpop.f32.mrb[27].mxu0  ;;  %817 = vmatmul.mubr.bf16.gmra.mrb[8].mxu1 %v508_v22  ;;  %v458_v32 = vmax.f32 %v336_v25, 0.0 }
 0x123   :  { %v342_v31 = vadd.f32 %v341_v30, %v1831_v61  ;;  %v459_v34 = vmax.f32 %v338_v27, 0.0 }
 0x124   :  { %v460_v33 = vmax.f32 %v340_v29, 0.0 }
 0x125   :  { %v461_v35 = vmax.f32 %v342_v31, 0.0 }
 0x126   :  { %v510_v36 = vpack.c.bf16 %v460_v33, %v458_v32 }
 0x127   :  { %v511_v37 = vpack.c.bf16 %v461_v35, %v459_v34  ;;  %v345_v38 = vpop.f32.mrb[28].mxu0 }
 0x128   :  { %v346_v39 = vadd.f32 %v345_v38, %v1827_v60  ;;  %v347_v40 = vpop.f32.mrb[29].mxu0 }
 0x129   :  { %v348_v41 = vadd.f32 %v347_v40, %v1831_v61  ;;  %v349_v42 = vpop.f32.mrb[30].mxu0  ;;  %826 = vmatprep.mubr.bf16.mxu1 %v511_v37 }
 0x12a   :  { %v350_v43 = vadd.f32 %v349_v42, %v1827_v60  ;;  %v351_v44 = vpop.f32.mrb[31].mxu0  ;;  %827 = vmatmul.mubr.bf16.gmra.mrb[12].mxu1 %v510_v36  ;;  %v462_v46 = vmax.f32 %v346_v39, 0.0 }
 0x12b   :  { %v352_v45 = vadd.f32 %v351_v44, %v1831_v61  ;;  %v463_v48 = vmax.f32 %v348_v41, 0.0 }
 0x12c   :  { %v464_v47 = vmax.f32 %v350_v43, 0.0 }
 0x12d   :  { %v465_v49 = vmax.f32 %v352_v45, 0.0 }
 0x12e   :  { %v512_v50 = vpack.c.bf16 %v464_v47, %v462_v46 }
 0x12f   :  { %v513_v51 = vpack.c.bf16 %v465_v49, %v463_v48  ;;  %v355_v52 = vpop.f32.mrb[32].mxu0 }
 0x130   :  { %v356_v53 = vadd.f32 %v355_v52, %v1827_v60  ;;  %v357_v54 = vpop.f32.mrb[33].mxu0 }
 0x131   :  { %v358_v58 = vadd.f32 %v357_v54, %v1831_v61  ;;  %v359_v62 = vpop.f32.mrb[34].mxu0  ;;  %836 = vmatprep.mubr.bf16.mxu1 %v513_v51 }
 0x132   :  { %v360_v63 = vadd.f32 %v359_v62, %v1827_v60  ;;  %v361_v0 = vpop.f32.mrb[35].mxu0  ;;  %837 = vmatmul.mubr.bf16.gmra.mrb[16].mxu1 %v512_v50  ;;  %v466_v2 = vmax.f32 %v356_v53, 0.0 }
 0x133   :  { %v362_v1 = vadd.f32 %v361_v0, %v1831_v61  ;;  %v467_v4 = vmax.f32 %v358_v58, 0.0 }
 0x134   :  { %v468_v3 = vmax.f32 %v360_v63, 0.0 }
 0x135   :  { %v469_v5 = vmax.f32 %v362_v1, 0.0 }
 0x136   :  { %v514_v6 = vpack.c.bf16 %v468_v3, %v466_v2 }
 0x137   :  { %v515_v7 = vpack.c.bf16 %v469_v5, %v467_v4  ;;  %v365_v8 = vpop.f32.mrb[36].mxu0 }
 0x138   :  { %v366_v9 = vadd.f32 %v365_v8, %v1827_v60  ;;  %v367_v10 = vpop.f32.mrb[37].mxu0 }
 0x139   :  { %v368_v11 = vadd.f32 %v367_v10, %v1831_v61  ;;  %v369_v12 = vpop.f32.mrb[38].mxu0  ;;  %846 = vmatprep.mubr.bf16.mxu1 %v515_v7 }
 0x13a   :  { %v370_v13 = vadd.f32 %v369_v12, %v1827_v60  ;;  %v371_v14 = vpop.f32.mrb[39].mxu0  ;;  %847 = vmatmul.mubr.bf16.gmra.mrb[20].mxu1 %v514_v6  ;;  %v470_v16 = vmax.f32 %v366_v9, 0.0 }
 0x13b   :  { %v372_v15 = vadd.f32 %v371_v14, %v1831_v61  ;;  %v471_v18 = vmax.f32 %v368_v11, 0.0 }
 0x13c   :  { %v472_v17 = vmax.f32 %v370_v13, 0.0 }
 0x13d   :  { %v473_v19 = vmax.f32 %v372_v15, 0.0 }
 0x13e   :  { %v516_v20 = vpack.c.bf16 %v472_v17, %v470_v16 }
 0x13f   :  { %v517_v21 = vpack.c.bf16 %v473_v19, %v471_v18  ;;  %v375_v22 = vpop.f32.mrb[40].mxu0 }
 0x140   :  { %v376_v23 = vadd.f32 %v375_v22, %v1827_v60  ;;  %v377_v24 = vpop.f32.mrb[41].mxu0 }
 0x141   :  { %v378_v25 = vadd.f32 %v377_v24, %v1831_v61  ;;  %v379_v26 = vpop.f32.mrb[42].mxu0  ;;  %856 = vmatprep.mubr.bf16.mxu1 %v517_v21 }
 0x142   :  { %v380_v27 = vadd.f32 %v379_v26, %v1827_v60  ;;  %v381_v28 = vpop.f32.mrb[43].mxu0  ;;  %857 = vmatmul.mubr.bf16.gmra.mrb[24].mxu1 %v516_v20  ;;  %v474_v30 = vmax.f32 %v376_v23, 0.0 }
 0x143   :  { %v382_v29 = vadd.f32 %v381_v28, %v1831_v61  ;;  %v475_v32 = vmax.f32 %v378_v25, 0.0 }
 0x144   :  { %v476_v31 = vmax.f32 %v380_v27, 0.0 }
 0x145   :  { %v477_v33 = vmax.f32 %v382_v29, 0.0 }
 0x146   :  { %v518_v34 = vpack.c.bf16 %v476_v31, %v474_v30 }
 0x147   :  { %v519_v35 = vpack.c.bf16 %v477_v33, %v475_v32  ;;  %v385_v36 = vpop.f32.mrb[44].mxu0 }
 0x148   :  { %v386_v37 = vadd.f32 %v385_v36, %v1827_v60  ;;  %v387_v38 = vpop.f32.mrb[45].mxu0 }
 0x149   :  { %v388_v39 = vadd.f32 %v387_v38, %v1831_v61  ;;  %v389_v40 = vpop.f32.mrb[46].mxu0  ;;  %866 = vmatprep.mubr.bf16.mxu1 %v519_v35 }
 0x14a   :  { %v390_v41 = vadd.f32 %v389_v40, %v1827_v60  ;;  %v391_v42 = vpop.f32.mrb[47].mxu0  ;;  %867 = vmatmul.mubr.bf16.gmra.mrb[28].mxu1 %v518_v34  ;;  %v478_v44 = vmax.f32 %v386_v37, 0.0 }
 0x14b   :  { %v392_v43 = vadd.f32 %v391_v42, %v1831_v61  ;;  %v479_v46 = vmax.f32 %v388_v39, 0.0 }
 0x14c   :  { %v480_v45 = vmax.f32 %v390_v41, 0.0 }
 0x14d   :  { %v481_v47 = vmax.f32 %v392_v43, 0.0 }
 0x14e   :  { %v520_v48 = vpack.c.bf16 %v480_v45, %v478_v44 }
 0x14f   :  { %v521_v49 = vpack.c.bf16 %v481_v47, %v479_v46  ;;  %v395_v50 = vpop.f32.mrb[48].mxu0 }
 0x150   :  { %v396_v51 = vadd.f32 %v395_v50, %v1827_v60  ;;  %v397_v52 = vpop.f32.mrb[49].mxu0  ;;  %v1000_v50 = vsub.s32 2, %v1817_v56 }
 0x151   :  { %v398_v53 = vadd.f32 %v397_v52, %v1831_v61  ;;  %v399_v54 = vpop.f32.mrb[50].mxu0  ;;  %876 = vmatprep.mubr.bf16.mxu1 %v521_v49 }
 0x152   :  { %v400_v58 = vadd.f32 %v399_v54, %v1827_v60  ;;  %v401_v62 = vpop.f32.mrb[51].mxu0  ;;  %877 = vmatmul.mubr.bf16.gmra.mrb[32].mxu1 %v520_v48  ;;  %v482_v0 = vmax.f32 %v396_v51, 0.0  ;;  %v991_v48 = vld [vmem:[%s2254_s5] sm:$0x3] }
 0x153   :  { %v402_v63 = vadd.f32 %v401_v62, %v1831_v61  ;;  %v483_v2 = vmax.f32 %v398_v53, 0.0  ;;  %v992_v49 = vunpack.c.l.bf16 %v991_v48 }
 0x154   :  { %v484_v1 = vmax.f32 %v400_v58, 0.0 }
 0x155   :  { %v485_v3 = vmax.f32 %v402_v63, 0.0  ;;  %v997_v51 = vrot.slane %v992_v49, %v1820_v57  ;;  %v1001_v53 = vrot.slane %v992_v49, %v1000_v50 }
 0x156   :  { %v522_v4 = vpack.c.bf16 %v484_v1, %v482_v0 }
 0x157   :  { %v523_v5 = vpack.c.bf16 %v485_v3, %v483_v2  ;;  %v405_v6 = vpop.f32.mrb[52].mxu0  ;;  %v1914_v63 = vrot.slane %v997_v51, %v1820_v57  ;;  %v1918_v2 = vrot.slane %v1001_v53, %v1820_v57 }
 0x158   :  { %v406_v7 = vadd.f32 %v405_v6, %v1827_v60  ;;  %v407_v8 = vpop.f32.mrb[53].mxu0 }
 0x159   :  { %v408_v9 = vadd.f32 %v407_v8, %v1831_v61  ;;  %v409_v10 = vpop.f32.mrb[54].mxu0  ;;  %886 = vmatprep.mubr.bf16.mxu1 %v523_v5 }
 0x15a   :  { %v410_v11 = vadd.f32 %v409_v10, %v1827_v60  ;;  %v411_v12 = vpop.f32.mrb[55].mxu0  ;;  %887 = vmatmul.mubr.bf16.gmra.mrb[36].mxu1 %v522_v4  ;;  %v486_v14 = vmax.f32 %v406_v7, 0.0 }
 0x15b   :  { %v412_v13 = vadd.f32 %v411_v12, %v1831_v61  ;;  %v487_v16 = vmax.f32 %v408_v9, 0.0 }
 0x15c   :  { %v488_v15 = vmax.f32 %v410_v11, 0.0 }
 0x15d   :  { %v489_v17 = vmax.f32 %v412_v13, 0.0 }
 0x15e   :  { %v524_v18 = vpack.c.bf16 %v488_v15, %v486_v14 }
 0x15f   :  { %v525_v19 = vpack.c.bf16 %v489_v17, %v487_v16  ;;  %v415_v20 = vpop.f32.mrb[56].mxu0 }
 0x160   :  { %v416_v21 = vadd.f32 %v415_v20, %v1827_v60  ;;  %v417_v22 = vpop.f32.mrb[57].mxu0 }
 0x161   :  { %v418_v23 = vadd.f32 %v417_v22, %v1831_v61  ;;  %v419_v24 = vpop.f32.mrb[58].mxu0  ;;  %896 = vmatprep.mubr.bf16.mxu1 %v525_v19 }
 0x162   :  { %v420_v25 = vadd.f32 %v419_v24, %v1827_v60  ;;  %v421_v26 = vpop.f32.mrb[59].mxu0  ;;  %897 = vmatmul.mubr.bf16.gmra.mrb[40].mxu1 %v524_v18  ;;  %v490_v28 = vmax.f32 %v416_v21, 0.0 }
 0x163   :  { %v422_v27 = vadd.f32 %v421_v26, %v1831_v61  ;;  %v491_v30 = vmax.f32 %v418_v23, 0.0 }
 0x164   :  { %v492_v29 = vmax.f32 %v420_v25, 0.0 }
 0x165   :  { %v493_v31 = vmax.f32 %v422_v27, 0.0 }
 0x166   :  { %v526_v32 = vpack.c.bf16 %v492_v29, %v490_v28 }
 0x167   :  { %v527_v33 = vpack.c.bf16 %v493_v31, %v491_v30  ;;  %v425_v34 = vpop.f32.mrb[60].mxu0 }
 0x168   :  { %v426_v35 = vadd.f32 %v425_v34, %v1827_v60  ;;  %v427_v36 = vpop.f32.mrb[61].mxu0 }
 0x169   :  { %v428_v37 = vadd.f32 %v427_v36, %v1831_v61  ;;  %v429_v38 = vpop.f32.mrb[62].mxu0  ;;  %906 = vmatprep.mubr.bf16.mxu1 %v527_v33 }
 0x16a   :  { %v430_v39 = vadd.f32 %v429_v38, %v1827_v60  ;;  %v431_v40 = vpop.f32.mrb[63].mxu0  ;;  %907 = vmatmul.mubr.bf16.gmra.mrb[44].mxu1 %v526_v32  ;;  %v494_v42 = vmax.f32 %v426_v35, 0.0  ;;  %v562_v60 = vld [vmem:[%s2253_s4] sm:$0x3] }
 0x16b   :  { %v432_v41 = vadd.f32 %v431_v40, %v1831_v61  ;;  %v495_v44 = vmax.f32 %v428_v37, 0.0  ;;  %v1905_v61 = vrot.slane %v562_v60, %v1820_v57  ;;  %v1910_v52 = vrot.slane %v562_v60, %v86_v59 }
 0x16c   :  { %v496_v43 = vmax.f32 %v430_v39, 0.0 }
 0x16d   :  { %v497_v45 = vmax.f32 %v432_v41, 0.0 }
 0x16e   :  { %v528_v46 = vpack.c.bf16 %v496_v43, %v494_v42 }
 0x16f   :  { %v529_v47 = vpack.c.bf16 %v497_v45, %v495_v44 }
 0x171   :  { %916 = vmatprep.mubr.bf16.mxu1 %v529_v47 }
 0x172   :  { %917 = vmatmul.mubr.bf16.gmra.mrb[48].mxu1 %v528_v46 }
 0x1cd   :  { %v768_v54 = vpop.f32.mrb[64].mxu0 }
 0x1ce   :  { %v769_v58 = vadd.f32 %v768_v54, %v1905_v61  ;;  %v770_v62 = vpop.f32.mrb[65].mxu0 }
 0x1cf   :  { %v771_v0 = vadd.f32 %v770_v62, %v1910_v52  ;;  %v772_v1 = vpop.f32.mrb[66].mxu0 }
 0x1d0   :  { %v927_v3 = vmax.f32 %v769_v58, 0.0  ;;  %v773_v4 = vadd.f32 %v772_v1, %v1905_v61  ;;  %v774_v5 = vpop.f32.mrb[67].mxu0 }
 0x1d1   :  { %v928_v59 = vmax.f32 %v771_v0, 0.0  ;;  %v775_v6 = vadd.f32 %v774_v5, %v1910_v52 }
 0x1d2   :  { %v929_v7 = vmax.f32 %v773_v4, 0.0  ;;  %v1012_v8 = vmul.f32 %v1914_v63, %v927_v3 }
 0x1d3   :  { %v930_v9 = vmax.f32 %v775_v6, 0.0  ;;  %v1013_v10 = vmul.f32 %v1918_v2, %v928_v59 }
 0x1d4   :  { %v1014_v11 = vmul.f32 %v1914_v63, %v929_v7 }
 0x1d5   :  { %v1015_v12 = vmul.f32 %v1918_v2, %v930_v9  ;;  %v778_v13 = vpop.f32.mrb[68].mxu0  ;;  %v1076_v57 = vadd.f32 %v1013_v10, %v1012_v8 }
 0x1d6   :  { %v779_v14 = vadd.f32 %v778_v13, %v1905_v61  ;;  %v780_v15 = vpop.f32.mrb[69].mxu0 }
 0x1d7   :  { %v781_v16 = vadd.f32 %v780_v15, %v1910_v52  ;;  %v782_v17 = vpop.f32.mrb[70].mxu0  ;;  %1108 = vadd.xlane.f32.xlu0 %v1076_v57  ;;  %v1077_v18 = vadd.f32 %v1015_v12, %v1014_v11 }
 0x1d8   :  { %v931_v19 = vmax.f32 %v779_v14, 0.0  ;;  %v783_v20 = vadd.f32 %v782_v17, %v1905_v61  ;;  %v784_v21 = vpop.f32.mrb[71].mxu0 }
 0x1d9   :  { %v932_v22 = vmax.f32 %v781_v16, 0.0  ;;  %v785_v23 = vadd.f32 %v784_v21, %v1910_v52 }
 0x1da   :  { %v1016_v24 = vmul.f32 %v1914_v63, %v931_v19  ;;  %v933_v25 = vmax.f32 %v783_v20, 0.0 }
 0x1db   :  { %v1017_v26 = vmul.f32 %v1918_v2, %v932_v22  ;;  %v934_v27 = vmax.f32 %v785_v23, 0.0  ;;  %1110 = vadd.xlane.f32.xlu0 %v1077_v18 }
 0x1dc   :  { %v1018_v28 = vmul.f32 %v1914_v63, %v933_v25 }
 0x1dd   :  { %v1019_v29 = vmul.f32 %v1918_v2, %v934_v27  ;;  %v788_v30 = vpop.f32.mrb[72].mxu0  ;;  %v1078_v31 = vadd.f32 %v1017_v26, %v1016_v24 }
 0x1de   :  { %v789_v32 = vadd.f32 %v788_v30, %v1905_v61  ;;  %v790_v33 = vpop.f32.mrb[73].mxu0 }
 0x1df   :  { %v791_v34 = vadd.f32 %v790_v33, %v1910_v52  ;;  %v792_v35 = vpop.f32.mrb[74].mxu0  ;;  %1112 = vadd.xlane.f32.xlu0 %v1078_v31  ;;  %v1079_v36 = vadd.f32 %v1019_v29, %v1018_v28 }
 0x1e0   :  { %v935_v37 = vmax.f32 %v789_v32, 0.0  ;;  %v793_v38 = vadd.f32 %v792_v35, %v1905_v61  ;;  %v794_v39 = vpop.f32.mrb[75].mxu0 }
 0x1e1   :  { %v936_v40 = vmax.f32 %v791_v34, 0.0  ;;  %v795_v41 = vadd.f32 %v794_v39, %v1910_v52 }
 0x1e2   :  { %v1020_v42 = vmul.f32 %v1914_v63, %v935_v37  ;;  %v937_v43 = vmax.f32 %v793_v38, 0.0 }
 0x1e3   :  { %v1021_v44 = vmul.f32 %v1918_v2, %v936_v40  ;;  %v938_v45 = vmax.f32 %v795_v41, 0.0  ;;  %1114 = vadd.xlane.f32.xlu0 %v1079_v36 }
 0x1e4   :  { %v1022_v46 = vmul.f32 %v1914_v63, %v937_v43 }
 0x1e5   :  { %v1023_v47 = vmul.f32 %v1918_v2, %v938_v45  ;;  %v798_v48 = vpop.f32.mrb[0].mxu1  ;;  %v1080_v49 = vadd.f32 %v1021_v44, %v1020_v42 }
 0x1e6   :  { %v799_v60 = vadd.f32 %v798_v48, %v1905_v61  ;;  %v800_v50 = vpop.f32.mrb[1].mxu1 }
 0x1e7   :  { %v801_v51 = vadd.f32 %v800_v50, %v1910_v52  ;;  %v802_v53 = vpop.f32.mrb[2].mxu1  ;;  %1116 = vadd.xlane.f32.xlu0 %v1080_v49  ;;  %v1081_v54 = vadd.f32 %v1023_v47, %v1022_v46 }
 0x1e8   :  { %v939_v58 = vmax.f32 %v799_v60, 0.0  ;;  %v803_v62 = vadd.f32 %v802_v53, %v1905_v61  ;;  %v804_v0 = vpop.f32.mrb[3].mxu1 }
 0x1e9   :  { %v940_v1 = vmax.f32 %v801_v51, 0.0  ;;  %v805_v3 = vadd.f32 %v804_v0, %v1910_v52 }
 0x1ea   :  { %v1024_v4 = vmul.f32 %v1914_v63, %v939_v58  ;;  %v941_v5 = vmax.f32 %v803_v62, 0.0 }
 0x1eb   :  { %v1025_v59 = vmul.f32 %v1918_v2, %v940_v1  ;;  %v942_v6 = vmax.f32 %v805_v3, 0.0  ;;  %1118 = vadd.xlane.f32.xlu0 %v1081_v54 }
 0x1ec   :  { %v1026_v7 = vmul.f32 %v1914_v63, %v941_v5 }
 0x1ed   :  { %v1027_v8 = vmul.f32 %v1918_v2, %v942_v6  ;;  %v808_v9 = vpop.f32.mrb[4].mxu1  ;;  %v1082_v10 = vadd.f32 %v1025_v59, %v1024_v4 }
 0x1ee   :  { %v809_v11 = vadd.f32 %v808_v9, %v1905_v61  ;;  %v810_v12 = vpop.f32.mrb[5].mxu1 }
 0x1ef   :  { %v811_v13 = vadd.f32 %v810_v12, %v1910_v52  ;;  %v812_v57 = vpop.f32.mrb[6].mxu1  ;;  %1120 = vadd.xlane.f32.xlu0 %v1082_v10  ;;  %v1083_v14 = vadd.f32 %v1027_v8, %v1026_v7 }
 0x1f0   :  { %v943_v15 = vmax.f32 %v809_v11, 0.0  ;;  %v813_v16 = vadd.f32 %v812_v57, %v1905_v61  ;;  %v814_v17 = vpop.f32.mrb[7].mxu1 }
 0x1f1   :  { %v944_v18 = vmax.f32 %v811_v13, 0.0  ;;  %v815_v19 = vadd.f32 %v814_v17, %v1910_v52 }
 0x1f2   :  { %v1028_v20 = vmul.f32 %v1914_v63, %v943_v15  ;;  %v945_v21 = vmax.f32 %v813_v16, 0.0 }
 0x1f3   :  { %v1029_v22 = vmul.f32 %v1918_v2, %v944_v18  ;;  %v946_v23 = vmax.f32 %v815_v19, 0.0  ;;  %1122 = vadd.xlane.f32.xlu0 %v1083_v14 }
 0x1f4   :  { %v1030_v24 = vmul.f32 %v1914_v63, %v945_v21 }
 0x1f5   :  { %v1031_v25 = vmul.f32 %v1918_v2, %v946_v23  ;;  %v818_v26 = vpop.f32.mrb[8].mxu1  ;;  %v1084_v27 = vadd.f32 %v1029_v22, %v1028_v20 }
 0x1f6   :  { %v819_v28 = vadd.f32 %v818_v26, %v1905_v61  ;;  %v820_v29 = vpop.f32.mrb[9].mxu1 }
 0x1f7   :  { %v821_v30 = vadd.f32 %v820_v29, %v1910_v52  ;;  %v822_v31 = vpop.f32.mrb[10].mxu1  ;;  %1124 = vadd.xlane.f32.xlu0 %v1084_v27  ;;  %v1085_v32 = vadd.f32 %v1031_v25, %v1030_v24 }
 0x1f8   :  { %v947_v33 = vmax.f32 %v819_v28, 0.0  ;;  %v823_v34 = vadd.f32 %v822_v31, %v1905_v61  ;;  %v824_v35 = vpop.f32.mrb[11].mxu1 }
 0x1f9   :  { %v948_v36 = vmax.f32 %v821_v30, 0.0  ;;  %v825_v37 = vadd.f32 %v824_v35, %v1910_v52 }
 0x1fa   :  { %v1032_v38 = vmul.f32 %v1914_v63, %v947_v33  ;;  %v949_v39 = vmax.f32 %v823_v34, 0.0 }
 0x1fb   :  { %v1033_v40 = vmul.f32 %v1918_v2, %v948_v36  ;;  %v950_v41 = vmax.f32 %v825_v37, 0.0  ;;  %1126 = vadd.xlane.f32.xlu0 %v1085_v32 }
 0x1fc   :  { %v1034_v42 = vmul.f32 %v1914_v63, %v949_v39 }
 0x1fd   :  { %v1035_v43 = vmul.f32 %v1918_v2, %v950_v41  ;;  %v828_v44 = vpop.f32.mrb[12].mxu1  ;;  %v1086_v45 = vadd.f32 %v1033_v40, %v1032_v38 }
 0x1fe   :  { %v829_v46 = vadd.f32 %v828_v44, %v1905_v61  ;;  %v830_v47 = vpop.f32.mrb[13].mxu1 }
 0x1ff   :  { %v831_v48 = vadd.f32 %v830_v47, %v1910_v52  ;;  %v832_v49 = vpop.f32.mrb[14].mxu1  ;;  %1128 = vadd.xlane.f32.xlu0 %v1086_v45  ;;  %v1087_v60 = vadd.f32 %v1035_v43, %v1034_v42 }
 0x200   :  { %v951_v50 = vmax.f32 %v829_v46, 0.0  ;;  %v833_v51 = vadd.f32 %v832_v49, %v1905_v61  ;;  %v834_v53 = vpop.f32.mrb[15].mxu1 }
 0x201   :  { %v952_v54 = vmax.f32 %v831_v48, 0.0  ;;  %v835_v58 = vadd.f32 %v834_v53, %v1910_v52 }
 0x202   :  { %v1036_v62 = vmul.f32 %v1914_v63, %v951_v50  ;;  %v953_v0 = vmax.f32 %v833_v51, 0.0 }
 0x203   :  { %v1037_v1 = vmul.f32 %v1918_v2, %v952_v54  ;;  %v954_v3 = vmax.f32 %v835_v58, 0.0  ;;  %1130 = vadd.xlane.f32.xlu0 %v1087_v60 }
 0x204   :  { %v1038_v4 = vmul.f32 %v1914_v63, %v953_v0 }
 0x205   :  { %v1039_v5 = vmul.f32 %v1918_v2, %v954_v3  ;;  %v838_v59 = vpop.f32.mrb[16].mxu1  ;;  %v1088_v6 = vadd.f32 %v1037_v1, %v1036_v62 }
 0x206   :  { %v839_v7 = vadd.f32 %v838_v59, %v1905_v61  ;;  %v840_v8 = vpop.f32.mrb[17].mxu1 }
 0x207   :  { %v841_v9 = vadd.f32 %v840_v8, %v1910_v52  ;;  %v842_v10 = vpop.f32.mrb[18].mxu1  ;;  %1132 = vadd.xlane.f32.xlu0 %v1088_v6  ;;  %v1089_v11 = vadd.f32 %v1039_v5, %v1038_v4 }
 0x208   :  { %v955_v12 = vmax.f32 %v839_v7, 0.0  ;;  %v843_v13 = vadd.f32 %v842_v10, %v1905_v61  ;;  %v844_v57 = vpop.f32.mrb[19].mxu1 }
 0x209   :  { %v956_v14 = vmax.f32 %v841_v9, 0.0  ;;  %v845_v15 = vadd.f32 %v844_v57, %v1910_v52 }
 0x20a   :  { %v1040_v16 = vmul.f32 %v1914_v63, %v955_v12  ;;  %v957_v17 = vmax.f32 %v843_v13, 0.0 }
 0x20b   :  { %v1041_v18 = vmul.f32 %v1918_v2, %v956_v14  ;;  %v958_v19 = vmax.f32 %v845_v15, 0.0  ;;  %1134 = vadd.xlane.f32.xlu0 %v1089_v11 }
 0x20c   :  { %v1042_v20 = vmul.f32 %v1914_v63, %v957_v17 }
 0x20d   :  { %v1043_v21 = vmul.f32 %v1918_v2, %v958_v19  ;;  %v848_v22 = vpop.f32.mrb[20].mxu1  ;;  %v1090_v23 = vadd.f32 %v1041_v18, %v1040_v16 }
 0x20e   :  { %v849_v24 = vadd.f32 %v848_v22, %v1905_v61  ;;  %v850_v25 = vpop.f32.mrb[21].mxu1 }
 0x20f   :  { %v851_v26 = vadd.f32 %v850_v25, %v1910_v52  ;;  %v852_v27 = vpop.f32.mrb[22].mxu1  ;;  %1136 = vadd.xlane.f32.xlu0 %v1090_v23  ;;  %v1091_v28 = vadd.f32 %v1043_v21, %v1042_v20 }
 0x210   :  { %v959_v29 = vmax.f32 %v849_v24, 0.0  ;;  %v853_v30 = vadd.f32 %v852_v27, %v1905_v61  ;;  %v854_v31 = vpop.f32.mrb[23].mxu1 }
 0x211   :  { %v960_v32 = vmax.f32 %v851_v26, 0.0  ;;  %v855_v33 = vadd.f32 %v854_v31, %v1910_v52 }
 0x212   :  { %v961_v34 = vmax.f32 %v853_v30, 0.0  ;;  %v1044_v35 = vmul.f32 %v1914_v63, %v959_v29 }
 0x213   :  { %v962_v36 = vmax.f32 %v855_v33, 0.0  ;;  %1138 = vadd.xlane.f32.xlu0 %v1091_v28  ;;  %v1045_v37 = vmul.f32 %v1918_v2, %v960_v32 }
 0x214   :  { %v1046_v38 = vmul.f32 %v1914_v63, %v961_v34 }
 0x215   :  { %v1047_v39 = vmul.f32 %v1918_v2, %v962_v36  ;;  %v858_v40 = vpop.f32.mrb[24].mxu1  ;;  %v1092_v41 = vadd.f32 %v1045_v37, %v1044_v35 }
 0x216   :  { %v859_v42 = vadd.f32 %v858_v40, %v1905_v61  ;;  %v860_v43 = vpop.f32.mrb[25].mxu1 }
 0x217   :  { %v861_v44 = vadd.f32 %v860_v43, %v1910_v52  ;;  %v862_v45 = vpop.f32.mrb[26].mxu1  ;;  %1140 = vadd.xlane.f32.xlu1 %v1092_v41  ;;  %v1093_v46 = vadd.f32 %v1047_v39, %v1046_v38 }
 0x218   :  { %v963_v47 = vmax.f32 %v859_v42, 0.0  ;;  %v863_v48 = vadd.f32 %v862_v45, %v1905_v61  ;;  %v864_v49 = vpop.f32.mrb[27].mxu1 }
 0x219   :  { %v964_v60 = vmax.f32 %v861_v44, 0.0  ;;  %v865_v50 = vadd.f32 %v864_v49, %v1910_v52 }
 0x21a   :  { %v1048_v51 = vmul.f32 %v1914_v63, %v963_v47  ;;  %v965_v53 = vmax.f32 %v863_v48, 0.0 }
 0x21b   :  { %v1049_v54 = vmul.f32 %v1918_v2, %v964_v60  ;;  %v966_v58 = vmax.f32 %v865_v50, 0.0  ;;  %1142 = vadd.xlane.f32.xlu1 %v1093_v46 }
 0x21c   :  { %v1050_v62 = vmul.f32 %v1914_v63, %v965_v53 }
 0x21d   :  { %v1051_v0 = vmul.f32 %v1918_v2, %v966_v58  ;;  %v868_v1 = vpop.f32.mrb[28].mxu1  ;;  %v1094_v3 = vadd.f32 %v1049_v54, %v1048_v51 }
 0x21e   :  { %v869_v4 = vadd.f32 %v868_v1, %v1905_v61  ;;  %v870_v5 = vpop.f32.mrb[29].mxu1 }
 0x21f   :  { %v871_v59 = vadd.f32 %v870_v5, %v1910_v52  ;;  %v872_v6 = vpop.f32.mrb[30].mxu1  ;;  %1144 = vadd.xlane.f32.xlu1 %v1094_v3  ;;  %v1095_v7 = vadd.f32 %v1051_v0, %v1050_v62 }
 0x220   :  { %v967_v8 = vmax.f32 %v869_v4, 0.0  ;;  %v873_v9 = vadd.f32 %v872_v6, %v1905_v61  ;;  %v874_v10 = vpop.f32.mrb[31].mxu1 }
 0x221   :  { %v968_v11 = vmax.f32 %v871_v59, 0.0  ;;  %v875_v12 = vadd.f32 %v874_v10, %v1910_v52 }
 0x222   :  { %v1052_v13 = vmul.f32 %v1914_v63, %v967_v8  ;;  %v969_v57 = vmax.f32 %v873_v9, 0.0 }
 0x223   :  { %v1053_v14 = vmul.f32 %v1918_v2, %v968_v11  ;;  %v970_v15 = vmax.f32 %v875_v12, 0.0  ;;  %1146 = vadd.xlane.f32.xlu1 %v1095_v7 }
 0x224   :  { %v1054_v16 = vmul.f32 %v1914_v63, %v969_v57 }
 0x225   :  { %v1055_v17 = vmul.f32 %v1918_v2, %v970_v15  ;;  %v878_v18 = vpop.f32.mrb[32].mxu1  ;;  %v1096_v19 = vadd.f32 %v1053_v14, %v1052_v13 }
 0x226   :  { %v879_v20 = vadd.f32 %v878_v18, %v1905_v61  ;;  %v880_v21 = vpop.f32.mrb[33].mxu1 }
 0x227   :  { %v881_v22 = vadd.f32 %v880_v21, %v1910_v52  ;;  %v882_v23 = vpop.f32.mrb[34].mxu1  ;;  %1148 = vadd.xlane.f32.xlu1 %v1096_v19  ;;  %v1097_v24 = vadd.f32 %v1055_v17, %v1054_v16 }
 0x228   :  { %v971_v25 = vmax.f32 %v879_v20, 0.0  ;;  %v883_v26 = vadd.f32 %v882_v23, %v1905_v61  ;;  %v884_v27 = vpop.f32.mrb[35].mxu1 }
 0x229   :  { %v972_v28 = vmax.f32 %v881_v22, 0.0  ;;  %v885_v29 = vadd.f32 %v884_v27, %v1910_v52 }
 0x22a   :  { %v1056_v30 = vmul.f32 %v1914_v63, %v971_v25  ;;  %v973_v31 = vmax.f32 %v883_v26, 0.0 }
 0x22b   :  { %v1057_v32 = vmul.f32 %v1918_v2, %v972_v28  ;;  %v974_v33 = vmax.f32 %v885_v29, 0.0  ;;  %1150 = vadd.xlane.f32.xlu1 %v1097_v24 }
 0x22c   :  { %v1058_v34 = vmul.f32 %v1914_v63, %v973_v31 }
 0x22d   :  { %v1059_v35 = vmul.f32 %v1918_v2, %v974_v33  ;;  %v888_v36 = vpop.f32.mrb[36].mxu1  ;;  %v1098_v37 = vadd.f32 %v1057_v32, %v1056_v30 }
 0x22e   :  { %v889_v38 = vadd.f32 %v888_v36, %v1905_v61  ;;  %v890_v39 = vpop.f32.mrb[37].mxu1 }
 0x22f   :  { %v891_v40 = vadd.f32 %v890_v39, %v1910_v52  ;;  %v892_v41 = vpop.f32.mrb[38].mxu1  ;;  %1152 = vadd.xlane.f32.xlu1 %v1098_v37  ;;  %v1099_v42 = vadd.f32 %v1059_v35, %v1058_v34 }
 0x230   :  { %v975_v43 = vmax.f32 %v889_v38, 0.0  ;;  %v893_v44 = vadd.f32 %v892_v41, %v1905_v61  ;;  %v894_v45 = vpop.f32.mrb[39].mxu1 }
 0x231   :  { %v976_v46 = vmax.f32 %v891_v40, 0.0  ;;  %v895_v47 = vadd.f32 %v894_v45, %v1910_v52 }
 0x232   :  { %v1060_v48 = vmul.f32 %v1914_v63, %v975_v43  ;;  %v977_v49 = vmax.f32 %v893_v44, 0.0 }
 0x233   :  { %v1061_v60 = vmul.f32 %v1918_v2, %v976_v46  ;;  %v978_v50 = vmax.f32 %v895_v47, 0.0  ;;  %1154 = vadd.xlane.f32.xlu1 %v1099_v42 }
 0x234   :  { %v1062_v51 = vmul.f32 %v1914_v63, %v977_v49 }
 0x235   :  { %v1063_v53 = vmul.f32 %v1918_v2, %v978_v50  ;;  %v898_v54 = vpop.f32.mrb[40].mxu1  ;;  %v1100_v58 = vadd.f32 %v1061_v60, %v1060_v48 }
 0x236   :  { %v899_v62 = vadd.f32 %v898_v54, %v1905_v61  ;;  %v900_v0 = vpop.f32.mrb[41].mxu1 }
 0x237   :  { %v901_v1 = vadd.f32 %v900_v0, %v1910_v52  ;;  %v902_v3 = vpop.f32.mrb[42].mxu1  ;;  %1156 = vadd.xlane.f32.xlu1 %v1100_v58  ;;  %v1101_v4 = vadd.f32 %v1063_v53, %v1062_v51 }
 0x238   :  { %v979_v5 = vmax.f32 %v899_v62, 0.0  ;;  %v903_v59 = vadd.f32 %v902_v3, %v1905_v61  ;;  %v904_v6 = vpop.f32.mrb[43].mxu1 }
 0x239   :  { %v980_v7 = vmax.f32 %v901_v1, 0.0  ;;  %v905_v8 = vadd.f32 %v904_v6, %v1910_v52 }
 0x23a   :  { %v1064_v9 = vmul.f32 %v1914_v63, %v979_v5  ;;  %v981_v10 = vmax.f32 %v903_v59, 0.0 }
 0x23b   :  { %v1065_v11 = vmul.f32 %v1918_v2, %v980_v7  ;;  %v982_v12 = vmax.f32 %v905_v8, 0.0  ;;  %1158 = vadd.xlane.f32.xlu1 %v1101_v4 }
 0x23c   :  { %v1066_v13 = vmul.f32 %v1914_v63, %v981_v10 }
 0x23d   :  { %v1067_v57 = vmul.f32 %v1918_v2, %v982_v12  ;;  %v908_v14 = vpop.f32.mrb[44].mxu1  ;;  %v1102_v15 = vadd.f32 %v1065_v11, %v1064_v9  ;;  %v1239_v9 = vand.u32 127, %v80_v55 }
 0x23e   :  { %v909_v16 = vadd.f32 %v908_v14, %v1905_v61  ;;  %v910_v17 = vpop.f32.mrb[45].mxu1 }
 0x23f   :  { %v911_v18 = vadd.f32 %v910_v17, %v1910_v52  ;;  %v912_v19 = vpop.f32.mrb[46].mxu1  ;;  %1160 = vadd.xlane.f32.xlu1 %v1102_v15  ;;  %v1103_v20 = vadd.f32 %v1067_v57, %v1066_v13  ;;  %v1244_v11 = vadd.s32 4294967288, %v1239_v9  ;;  %v1251_v12 = vadd.s32 4294967280, %v1239_v9 }
 0x240   :  { %v983_v21 = vmax.f32 %v909_v16, 0.0  ;;  %v913_v22 = vadd.f32 %v912_v19, %v1905_v61  ;;  %v914_v23 = vpop.f32.mrb[47].mxu1  ;;  %v1258_v13 = vadd.s32 4294967272, %v1239_v9  ;;  %v1265_v14 = vadd.s32 4294967264, %v1239_v9 }
 0x241   :  { %v984_v24 = vmax.f32 %v911_v18, 0.0  ;;  %v915_v25 = vadd.f32 %v914_v23, %v1910_v52  ;;  %v1272_v15 = vadd.s32 4294967256, %v1239_v9  ;;  %v2074_v16 = vstv %s2255_s6  ;;  %s1674_s6 = smov [#allocation6]  }
 0x242   :  { %v1068_v26 = vmul.f32 %v1914_v63, %v983_v21  ;;  %v985_v27 = vmax.f32 %v913_v22, 0.0  ;;  %v1279_v17 = vadd.s32 4294967248, %v1239_v9  ;;  %v2079_v19 = vsub.s32 %v1239_v9, %v1817_v56  ;;  %s1438_s30 = sshll.u32 %s1674_s6, 4  ;;  %s1439_s30 = int_to_ptr.vmem [resolvable:$true] %s1438_s30 }
 0x243   :  { %v1069_v28 = vmul.f32 %v1918_v2, %v984_v24  ;;  %v986_v29 = vmax.f32 %v915_v25, 0.0  ;;  %1162 = vadd.xlane.f32.xlu1 %v1103_v20  ;;  %v2082_v55 = vsub.s32 %v1244_v11, %v1817_v56  ;;  %v2085_v20 = vsub.s32 %v1251_v12, %v1817_v56  ;;  %s1644_s8 = scalar_lea.vmem %s1439_s30, 32  ;;  %p1649_p9 = scmp.lt.s32.totalorder %s1439_s30, %s1439_s30 }
 0x244   :  { %v1070_v30 = vmul.f32 %v1914_v63, %v985_v27  ;;  %v2088_v21 = vsub.s32 %v1258_v13, %v1817_v56  ;;  %v1286_v22 = vadd.s32 4294967240, %v1239_v9  ;;  %v2092_v24 = vsub.s32 %v1265_v14, %v1817_v56  ;;  %p1645_p8 = scmp.ne.s32.totalorder %s1439_s30, %s1644_s8  ;;  %p1650_p10 = scmp.lt.s32.totalorder %s1644_s8, %s1644_s8 }
 0x245   :  { %v1071_v31 = vmul.f32 %v1918_v2, %v986_v29  ;;  %v918_v32 = vpop.f32.mrb[48].mxu1  ;;  %v1104_v33 = vadd.f32 %v1069_v28, %v1068_v26  ;;  %v2095_v25 = vsub.s32 %v1272_v15, %v1817_v56  ;;  %v2099_v27 = vsub.s32 %v1279_v17, %v1817_v56 }
 0x246   :  { %v919_v34 = vadd.f32 %v918_v32, %v1905_v61  ;;  %v920_v35 = vpop.f32.mrb[49].mxu1  ;;  %v1293_v28 = vadd.s32 4294967232, %v1239_v9  ;;  %v1300_v29 = vadd.s32 4294967224, %v1239_v9  ;;  %v1342_v13 = vadd.s32 4294967176, %v1239_v9  ;;  %p1651_p11 = por %p1650_p10, %p1649_p9 }
 0x247   :  { %v921_v36 = vadd.f32 %v920_v35, %v1910_v52  ;;  %v922_v37 = vpop.f32.mrb[50].mxu1  ;;  %1164 = vadd.xlane.f32.xlu1 %v1104_v33  ;;  %v1105_v38 = vadd.f32 %v1071_v31, %v1070_v30 }
 0x248   :  { %v987_v39 = vmax.f32 %v919_v34, 0.0  ;;  %v923_v40 = vadd.f32 %v922_v37, %v1905_v61  ;;  %v924_v41 = vpop.f32.mrb[51].mxu1  ;;  %v1307_v34 = vadd.s32 4294967216, %v1239_v9  ;;  %v1314_v37 = vadd.s32 4294967208, %v1239_v9  ;;  %p1652_p12 = pnand %p1651_p11, %p1645_p8 }
 0x249   :  { %v988_v42 = vmax.f32 %v921_v36, 0.0  ;;  %v925_v43 = vadd.f32 %v924_v41, %v1910_v52  ;;  %v2109_v36 = vsub.s32 %v1286_v22, %v1817_v56  ;;  %v1328_v41 = vadd.s32 4294967192, %v1239_v9 }
 0x24a   :  { %v1072_v44 = vmul.f32 %v1914_v63, %v987_v39  ;;  %v989_v45 = vmax.f32 %v923_v40, 0.0 }
 0x24b   :  { %v1073_v46 = vmul.f32 %v1918_v2, %v988_v42  ;;  %v990_v47 = vmax.f32 %v925_v43, 0.0  ;;  %1166 = vadd.xlane.f32.xlu1 %v1105_v38  ;;  %v1321_v38 = vadd.s32 4294967200, %v1239_v9 }
 0x24c   :  { %v1074_v48 = vmul.f32 %v1914_v63, %v989_v45  ;;  %v2119_v45 = vsub.s32 %v1300_v29, %v1817_v56 }
 0x24d   :  { %v1075_v49 = vmul.f32 %v1918_v2, %v990_v47  ;;  %v1106_v60 = vadd.f32 %v1073_v46, %v1072_v44  ;;  %v2116_v44 = vsub.s32 %v1293_v28, %v1817_v56 }
 0x24f   :  { %1168 = vadd.xlane.f32.xlu1 %v1106_v60  ;;  %v1107_v50 = vadd.f32 %v1075_v49, %v1074_v48  ;;  %v2124_v49 = vsub.s32 %v1307_v34, %v1817_v56  ;;  %v1335_v60 = vadd.s32 4294967184, %v1239_v9 }
 0x251   :  { %v2147_v22 = vsub.s32 %v1335_v60, %v1817_v56 }
 0x253   :  { %1170 = vadd.xlane.f32.xlu1 %v1107_v50 }
 0x264   :  { %v1109_v61 = vpop.xlane.xlu0 %1108 }
 0x265   :  { %v1174_v32 = vadd.f32 %v2074_v16, %v1109_v61 }
 0x267   :  { %v1243_v47 = vrot.slane %v1174_v32, %v2079_v19 }
 0x268   :  { %v1111_v51 = vpop.xlane.xlu0 %1110 }
 0x269   :  { %v1175_v23 = vadd.f32 %v2074_v16, %v1111_v51  ;;  %v2129_v51 = vsub.s32 %v1314_v37, %v1817_v56 }
 0x26b   :  { %v1248_v39 = vrot.slane %v1175_v23, %v2082_v55 }
 0x26c   :  { %v1113_v53 = vpop.xlane.xlu0 %1112 }
 0x26d   :  { %v1176_v26 = vadd.f32 %v2074_v16, %v1113_v53  ;;  %v2132_v53 = vsub.s32 %v1321_v38, %v1817_v56 }
 0x26f   :  { %v1255_v42 = vrot.slane %v1176_v26, %v2085_v20 }
 0x270   :  { %v1115_v54 = vpop.xlane.xlu0 %1114 }
 0x271   :  { %v1177_v33 = vadd.f32 %v2074_v16, %v1115_v54 }
 0x273   :  { %v1262_v48 = vrot.slane %v1177_v33, %v2088_v21 }
 0x274   :  { %v1117_v52 = vpop.xlane.xlu0 %1116 }
 0x275   :  { %v1178_v35 = vadd.f32 %v2074_v16, %v1117_v52  ;;  %v1250_v52 = vsel %vm1249_vm2, %v1248_v39, %v1243_v47 }
 0x276   :  { %v1257_v12 = vsel %vm1256_vm3, %v1255_v42, %v1250_v52 }
 0x277   :  { %v1269_v50 = vrot.slane %v1178_v35, %v2092_v24  ;;  %v1264_v17 = vsel %vm1263_vm4, %v1262_v48, %v1257_v12 }
 0x278   :  { %v1119_v58 = vpop.xlane.xlu0 %1118 }
 0x279   :  { %v1179_v40 = vadd.f32 %v2074_v16, %v1119_v58  ;;  %v1271_v26 = vsel %vm1270_vm5, %v1269_v50, %v1264_v17 }
 0x27b   :  { %v1276_v58 = vrot.slane %v1179_v40, %v2095_v25 }
 0x27c   :  { %v1121_v62 = vpop.xlane.xlu0 %1120 }
 0x27d   :  { %v1180_v43 = vadd.f32 %v2074_v16, %v1121_v62  ;;  %v2137_v62 = vsub.s32 %v1328_v41, %v1817_v56  ;;  %v1278_v29 = vsel %vm1277_vm6, %v1276_v58, %v1271_v26 }
 0x280   :  { %v1123_v3 = vpop.xlane.xlu0 %1122 }
 0x281   :  { %v1181_v61 = vadd.f32 %v2074_v16, %v1123_v3  ;;  %v1283_v3 = vrot.slane %v1180_v43, %v2099_v27 }
 0x283   :  { %v1290_v28 = vrot.slane %v1181_v61, %v2109_v36  ;;  %v1285_v33 = vsel %vm1284_vm7, %v1283_v3, %v1278_v29 }
 0x284   :  { %v2052_v63 = vpop.xlane.xlu0 %1124 }
 0x285   :  { %v1182_v9 = vadd.f32 %v2074_v16, %v2052_v63  ;;  %v2167_v63 = vsub.s32 %v1342_v13, %v1817_v56  ;;  %v1292_v56 = vsel %vm1291_vm8, %v1290_v28, %v1285_v33 }
 0x287   :  { %v1297_v39 = vrot.slane %v1182_v9, %v2116_v44 }
 0x288   :  { %v2058_v59 = vpop.xlane.xlu0 %1126 }
 0x289   :  { %v1183_v32 = vadd.f32 %v2074_v16, %v2058_v59 }
 0x28b   :  { %v1304_v40 = vrot.slane %v1183_v32, %v2119_v45 }
 0x28c   :  { %v2062_v7 = vpop.xlane.xlu0 %1128 }
 0x28d   :  { %v1184_v59 = vadd.f32 %v2074_v16, %v2062_v7 }
 0x28f   :  { %v1311_v43 = vrot.slane %v1184_v59, %v2124_v49 }
 0x290   :  { %v2069_v57 = vpop.xlane.xlu0 %1130 }
 0x294   :  { %v2101_v30 = vpop.xlane.xlu0 %1132 }
 0x298   :  { %v1135_v54 = vpop.xlane.xlu0 %1134 }
 0x299   :  { %v1187_v50 = vadd.f32 %v2074_v16, %v1135_v54 }
 0x29c   :  { %v1137_v34 = vpop.xlane.xlu0 %1136 }
 0x2a0   :  { %v1139_v48 = vpop.xlane.xlu0 %1138 }
 0x2a4   :  { %v2046_v0 = vpop.xlane.xlu1 %1140 }
 0x2a5   :  { %v1190_v23 = vadd.f32 %v2074_v16, %v2046_v0 }
 0x2a8   :  { %v2048_v1 = vpop.xlane.xlu1 %1142 }
 0x2a9   :  { %v1191_v11 = vadd.f32 %v2074_v16, %v2048_v1 }
 0x2ab   :  { %v1356_v0 = vrot.slane %v1191_v11, %v2082_v55  ;;  %v1352_v55 = vrot.slane %v1190_v23, %v2079_v19  ;;  %v1188_v11 = vadd.f32 %v2074_v16, %v1137_v34 }
 0x2ac   :  { %v2050_v4 = vpop.xlane.xlu1 %1144 }
 0x2ad   :  { %v1192_v14 = vadd.f32 %v2074_v16, %v2050_v4  ;;  %v1357_v7 = vsel %vm1249_vm2, %v1356_v0, %v1352_v55  ;;  %v1339_v9 = vrot.slane %v1188_v11, %v2147_v22 }
 0x2b0   :  { %v2054_v2 = vpop.xlane.xlu1 %1146 }
 0x2b1   :  { %v1193_v1 = vadd.f32 %v2074_v16, %v2054_v2 }
 0x2b4   :  { %v2056_v5 = vpop.xlane.xlu1 %1148 }
 0x2b5   :  { %v1194_v4 = vadd.f32 %v2074_v16, %v2056_v5  ;;  %v1361_v5 = vrot.slane %v1192_v14, %v2085_v20 }
 0x2b7   :  { %v1371_v20 = vrot.slane %v1194_v4, %v2092_v24  ;;  %v1362_v41 = vsel %vm1256_vm3, %v1361_v5, %v1357_v7 }
 0x2b8   :  { %v2060_v6 = vpop.xlane.xlu1 %1150 }
 0x2b9   :  { %v1195_v2 = vadd.f32 %v2074_v16, %v2060_v6  ;;  %v1366_v6 = vrot.slane %v1193_v1, %v2088_v21  ;;  %v1185_v21 = vadd.f32 %v2074_v16, %v2069_v57  ;;  %v1186_v57 = vadd.f32 %v2074_v16, %v2101_v30 }
 0x2bb   :  { %v1376_v19 = vrot.slane %v1195_v2, %v2095_v25  ;;  %v1367_v47 = vsel %vm1263_vm4, %v1366_v6, %v1362_v41  ;;  %v1318_v58 = vrot.slane %v1185_v21, %v2129_v51 }
 0x2bc   :  { %v2064_v8 = vpop.xlane.xlu1 %1152  ;;  %v1372_v60 = vsel %vm1270_vm5, %v1371_v20, %v1367_v47 }
 0x2bd   :  { %v1196_v35 = vadd.f32 %v2074_v16, %v2064_v8  ;;  %v1377_v61 = vsel %vm1277_vm6, %v1376_v19, %v1372_v60 }
 0x2bf   :  { %v1381_v24 = vrot.slane %v1196_v35, %v2099_v27 }
 0x2c0   :  { %v2067_v10 = vpop.xlane.xlu1 %1154 }
 0x2c1   :  { %v1197_v38 = vadd.f32 %v2074_v16, %v2067_v10  ;;  %v1382_v30 = vsel %vm1284_vm7, %v1381_v24, %v1377_v61 }
 0x2c3   :  { %v1386_v25 = vrot.slane %v1197_v38, %v2109_v36 }
 0x2c4   :  { %v2076_v18 = vpop.xlane.xlu1 %1156 }
 0x2c5   :  { %v1198_v8 = vadd.f32 %v2074_v16, %v2076_v18  ;;  %v1387_v13 = vsel %vm1291_vm8, %v1386_v25, %v1382_v30 }
 0x2c7   :  { %v1391_v27 = vrot.slane %v1198_v8, %v2116_v44  ;;  %v1189_v44 = vadd.f32 %v2074_v16, %v1139_v48 }
 0x2c8   :  { %v2103_v31 = vpop.xlane.xlu1 %1158 }
 0x2c9   :  { %v1199_v10 = vadd.f32 %v2074_v16, %v2103_v31  ;;  %v1392_v17 = vsel %vm1298_vm9, %v1391_v27, %v1387_v13 }
 0x2cb   :  { %v1396_v52 = vrot.slane %v1199_v10, %v2119_v45  ;;  %v1299_v45 = vsel %vm1298_vm9, %v1297_v39, %v1292_v56 }
 0x2cc   :  { %v1161_v46 = vpop.xlane.xlu1 %1160  ;;  %v1306_v1 = vsel %vm1305_vm10, %v1304_v40, %v1299_v45 }
 0x2cd   :  { %v1200_v18 = vadd.f32 %v2074_v16, %v1161_v46  ;;  %v1397_v26 = vsel %vm1305_vm10, %v1396_v52, %v1392_v17 }
 0x2cf   :  { %v1401_v12 = vrot.slane %v1200_v18, %v2124_v49  ;;  %v1332_v49 = vrot.slane %v1187_v50, %v2137_v62 }
 0x2d0   :  { %v1163_v15 = vpop.xlane.xlu1 %1162 }
 0x2d1   :  { %v1201_v31 = vadd.f32 %v2074_v16, %v1163_v15  ;;  %v1325_v15 = vrot.slane %v1186_v57, %v2132_v53  ;;  %v1402_v4 = vsel %vm1312_vm11, %v1401_v12, %v1397_v26 }
 0x2d3   :  { %v1406_v54 = vrot.slane %v1201_v31, %v2129_v51  ;;  %v1313_v51 = vsel %vm1312_vm11, %v1311_v43, %v1306_v1 }
 0x2d4   :  { %v1165_v37 = vpop.xlane.xlu1 %1164  ;;  %v1320_v0 = vsel %vm1319_vm12, %v1318_v58, %v1313_v51 }
 0x2d5   :  { %v1202_v46 = vadd.f32 %v2074_v16, %v1165_v37  ;;  %v1407_v2 = vsel %vm1319_vm12, %v1406_v54, %v1402_v4  ;;  %v1327_v34 = vsel %vm1326_vm13, %v1325_v15, %v1320_v0 }
 0x2d6   :  { %v1334_v5 = vsel %vm1333_vm14, %v1332_v49, %v1327_v34 }
 0x2d7   :  { %v1411_v23 = vrot.slane %v1202_v46, %v2132_v53  ;;  %v1346_v53 = vrot.slane %v1189_v44, %v2167_v63  ;;  %v1341_v37 = vsel %vm1340_vm15, %v1339_v9, %v1334_v5 }
 0x2d8   :  { %v1167_v42 = vpop.xlane.xlu1 %1166 }
 0x2d9   :  { %v1203_v36 = vadd.f32 %v2074_v16, %v1167_v42  ;;  %v1348_v55 = vsel %vm1347_vm0, %v1346_v53, %v1341_v37 }
 0x2db   :  { %v1416_v28 = vrot.slane %v1203_v36, %v2137_v62  ;;  %v1412_v62 = vsel %vm1326_vm13, %v1411_v23, %v1407_v2 }
 0x2dc   :  { %v1169_v3 = vpop.xlane.xlu1 %1168 }
 0x2dd   :  { %v1204_v14 = vadd.f32 %v2074_v16, %v1169_v3 }
 0x2df   :  { %v1421_v29 = vrot.slane %v1204_v14, %v2147_v22  ;;  %v1417_v22 = vsel %vm1333_vm14, %v1416_v28, %v1412_v62 }
 0x2e0   :  { %v1171_v32 = vpop.xlane.xlu1 %1170 }
 0x2e1   :  { %v1205_v33 = vadd.f32 %v2074_v16, %v1171_v32  ;;  %v1422_v59 = vsel %vm1340_vm15, %v1421_v29, %v1417_v22 }
 0x2e3   :  { %v1426_v35 = vrot.slane %v1205_v33, %v2167_v63 }
 0x2e5   :  { %v1427_v16 = vsel %vm1347_vm0, %v1426_v35, %v1422_v59 }
 0x2e6   :  { %v1429_v6 = vsel %vm1428_vm1, %v1427_v16, %v1348_v55 }
 0x2e7   :  { %1431 = vst [vmem:[#allocation6] sm:$0x3] %v1429_v6 }
 0x2e8   :  { %1655 = shalt.err (!%p1652_p12)
}
 0x2e9   :  { %s1656_s11 = scalar_lea.hbm %s2256_s7, 32 }
 0x2ea   :  { %p1657_p13 = scmp.ne.s32.totalorder %s2256_s7, %s1656_s11  ;;  %p1660_p0 = scmp.lt.u32.totalorder %s1656_s11, %s2256_s7 }
 0x2ec   :  { %p1662_p1 = pnand %p1660_p0, %p1657_p13 }
 0x2ee   :  { %1665 = shalt.err (!%p1662_p1)
}
 0x2ef   :  { %1441 = dma.vmem_to_hbm [thread:$0]  %s1439_s30, 32, %s2256_s7, [#allocation5]  }
 0x2f0   :  { %1668 = dma.done.wait [#allocation5], 32  }
 0x2f1   :  { %1669 = vsyncadd [#allocation5], 4294967264 }
 0x2f2   :  { %1445 = vsyncpa [#allocation4], 1 }
 0x2f3   :  { %1446 = vsyncpa [#allocation5], 1 }

</bundles_post_ra>
